<compile_context>
chip_gen: v7x
topology: tpu7x:2x2x1
jax: 0.10.0
libtpu: 0.0.40
codegen_flags: <defaults>
</compile_context>

<pallas_src>
import math

import numpy as np
import jax
import jax.numpy as jnp
from jax.experimental import pallas as pl
from jax.experimental.pallas import tpu as pltpu

LANE = 128                        # vreg lane width; all feature dims padded to this
_VMEM_LIMIT = 32 * 1024 * 1024    # > v5e's 16 MiB scoped default, < v7x's 64 MiB physical


def _rup(n, m=LANE):
    return ((n + m - 1) // m) * m


def _pad2(a, rows, cols):
    return jnp.pad(a, ((0, rows - a.shape[0]), (0, cols - a.shape[1])))


def _nbytes(arrs):
    return int(sum(int(a.size) * a.dtype.itemsize for a in arrs))


# ---------------------------------------------------------------------------
# Kernel 1: fused CNN stack
#   per layer: Conv1d('same', odd K) + folded eval-BN + LeakyReLU + MaxPool1d
# ---------------------------------------------------------------------------
def make_cnn_stack_kernel(L0, sizes, pools, neg_slope=0.01):
    n_layers = len(sizes)

    def kernel(*refs):
        x_ref = refs[0]
        w_refs = refs[1:1 + 3 * n_layers]
        o_ref = refs[1 + 3 * n_layers]

        x = x_ref[0]                                    # (L, LANE) f32
        L = L0
        for li in range(n_layers):
            w_ref, scale_ref, shift_ref = w_refs[3 * li:3 * li + 3]
            K, pool = sizes[li], pools[li]
            pad = K // 2                                # 'same' conv (odd K assumed)
            taps = []
            for t in range(K):                          # im2col via cheap XLU rolls
                dt = t - pad
                if dt == 0:
                    xs = x
                else:
                    xs = pltpu.roll(x, shift=(-dt) % L, axis=0)
                    rows = jax.lax.broadcasted_iota(jnp.int32, (L, LANE), 0)
                    xs = jnp.where((rows + dt >= 0) & (rows + dt < L), xs, 0.0)
                taps.append(xs.astype(jnp.bfloat16))
            xcol = jnp.concatenate(taps, axis=-1)       # (L, K*LANE) bf16
            y = jnp.dot(xcol, w_ref[...],               # single MXU matmul, f32 acc
                        preferred_element_type=jnp.float32)
            y = y * scale_ref[...] + shift_ref[...]     # conv bias + BN(eval) folded
            y = jnp.where(y >= 0, y, neg_slope * y)     # LeakyReLU(0.01)
            Lout = L // pool
            x = jnp.max(y[:Lout * pool].reshape(Lout, pool, LANE), axis=1)
            L = Lout
        o_ref[0] = x

    return kernel


def cnn_stack(x, cnn_params, cfg):
    # TODO(synk): for very long sequences add an L-tile grid axis with a
    # (K-1)+pool halo; at these shapes the whole sequence fits VMEM per step.
    B, L0, _ = x.shape
    sizes, pools = cfg["cnn_sizes"], cfg["cnn_pool"]
    S = L0
    for p in pools:
        S //= p

    args = []
    in_specs = [pl.BlockSpec((1, L0, LANE), lambda b: (b, 0, 0))]
    for blk in cnn_params:
        for name in ("w", "scale", "shift"):
            a = blk[name]
            args.append(a)
            in_specs.append(pl.BlockSpec(a.shape, lambda b: (0, 0)))

    flops, L = 0, L0
    for k, p in zip(sizes, pools):
        flops += 2 * B * L * (k * LANE) * LANE
        L //= p
    cost = pl.CostEstimate(flops=int(flops), transcendentals=0,
                           bytes_accessed=_nbytes([x]) + _nbytes(args)
                           + B * S * LANE * 4)

    return pl.pallas_call(
        make_cnn_stack_kernel(L0, sizes, pools),
        out_shape=jax.ShapeDtypeStruct((B, S, LANE), jnp.float32),
        grid=(B,),
        in_specs=in_specs,
        out_specs=pl.BlockSpec((1, S, LANE), lambda b: (b, 0, 0)),
        compiler_params=pltpu.CompilerParams(
            dimension_semantics=("parallel",),
            vmem_limit_bytes=_VMEM_LIMIT),
        cost_estimate=cost,
    )(x, *args)


# ---------------------------------------------------------------------------
# Kernel 2: pos-enc + fused TransformerEncoder layers + attention pool
#           (enh/prom gather via scalar prefetch) + fc / fc_dist heads
# ---------------------------------------------------------------------------
def make_encoder_head_kernel(S, D, Dpad, H, n_layers, n_fc, eps=1e-5):
    Dh = D // H
    Dhp = Dpad // H
    att_scale = 1.0 / math.sqrt(Dh)
    inv_d = 1.0 / D

    def layer_norm(y, g_ref, b_ref):
        # Padded lanes of y are zero, so lane-sums equal sums over the real D
        # features; gamma/beta are zero-padded so padded lanes stay zero.
        mu = jnp.sum(y, axis=-1, keepdims=True) * inv_d
        var = jnp.sum(y * y, axis=-1, keepdims=True) * inv_d - mu * mu
        return (y - mu) * jax.lax.rsqrt(var + eps) * g_ref[...] + b_ref[...]

    def kernel(*refs):
        enh_ref, prom_ref, x_ref, pos_ref = refs[:4]
        i = 4
        enc = refs[i:i + 12 * n_layers]; i += 12 * n_layers
        w_a1, b_a1, w_a2, b_a2 = refs[i:i + 4]; i += 4
        wd1, bd1, wd2, bd2 = refs[i:i + 4]; i += 4
        fc = refs[i:i + 2 * n_fc]; i += 2 * n_fc
        pred_ref, dist_ref = refs[i], refs[i + 1]
        feats_sc = refs[i + 2]

        b = pl.program_id(0)
        x = x_ref[0] + pos_ref[...]                     # (S, Dpad) f32

        for l in range(n_layers):                       # post-norm encoder layers
            (wqkv, bqkv, wo, bo, g1, be1,
             wf1, bf1, wf2, bf2, g2, be2) = enc[12 * l:12 * (l + 1)]
            xb = x.astype(jnp.bfloat16)
            qkv = jnp.dot(xb, wqkv[...],
                          preferred_element_type=jnp.float32) + bqkv[...]
            q = qkv[:, :Dpad]
            k = qkv[:, Dpad:2 * Dpad]
            v = qkv[:, 2 * Dpad:]
            # Heads are spread across the padded lanes (head h occupies lanes
            # [h*Dhp, h*Dhp + Dh)), so one reshape exposes the head axis.
            qh = jnp.transpose(q.reshape(S, H, Dhp), (1, 0, 2)).astype(jnp.bfloat16)
            kh = jnp.transpose(k.reshape(S, H, Dhp), (1, 0, 2)).astype(jnp.bfloat16)
            vh = jnp.transpose(v.reshape(S, H, Dhp), (1, 0, 2)).astype(jnp.bfloat16)
            s = jnp.einsum('hqd,hkd->hqk', qh, kh,
                           preferred_element_type=jnp.float32) * att_scale
            s = s - jnp.max(s, axis=-1, keepdims=True)
            p = jnp.exp(s)
            p = p * pl.reciprocal(jnp.sum(p, axis=-1, keepdims=True), approx=True)
            ctx = jnp.einsum('hqk,hkd->hqd', p.astype(jnp.bfloat16), vh,
                             preferred_element_type=jnp.float32)
            ctx = jnp.transpose(ctx, (1, 0, 2)).reshape(S, Dpad)
            attn = jnp.dot(ctx.astype(jnp.bfloat16), wo[...],
                           preferred_element_type=jnp.float32) + bo[...]
            y = layer_norm(x + attn, g1, be1)
            f = jnp.dot(y.astype(jnp.bfloat16), wf1[...],
                        preferred_element_type=jnp.float32) + bf1[...]
            f = jnp.maximum(f, 0.0)
            f = jnp.dot(f.astype(jnp.bfloat16), wf2[...],
                        preferred_element_type=jnp.float32) + bf2[...]
            x = layer_norm(y + f, g2, be2)

        feats_sc[...] = x                               # for dynamic row gather
        xb = x.astype(jnp.bfloat16)

        # attention pooling: tanh(att_first) -> att_second -> softmax over seq
        a = jnp.tanh(jnp.dot(xb, w_a1[...],
                             preferred_element_type=jnp.float32) + b_a1[...])
        s2 = jnp.dot(a.astype(jnp.bfloat16), w_a2[...],
                     preferred_element_type=jnp.float32) + b_a2[...]   # (S, r)
        s2 = s2 - jnp.max(s2, axis=0, keepdims=True)
        p2 = jnp.exp(s2)
        att = p2 * pl.reciprocal(jnp.sum(p2, axis=0, keepdims=True), approx=True)
        se = jax.lax.dot_general(att.astype(jnp.bfloat16), xb,
                                 (((0,), (0,)), ((), ())),
                                 preferred_element_type=jnp.float32)   # (r, Dpad)
        mean_se = jnp.sum(se, axis=0, keepdims=True) * (1.0 / se.shape[0])
        max_se = jnp.max(se, axis=0, keepdims=True)
        enh_row = feats_sc[pl.ds(enh_ref[b], 1), :]      # feats[enh_idx]
        prom_row = feats_sc[pl.ds(prom_ref[b], 1), :]    # feats[prom_idx]
        emb = jnp.concatenate([enh_row, prom_row, mean_se, max_se], axis=0)
        embb = emb.reshape(1, 4 * Dpad).astype(jnp.bfloat16)

        # fc_dist: Linear(4D, D) -> ReLU -> Linear(D, 1)
        d = jnp.dot(embb, wd1[...], preferred_element_type=jnp.float32) + bd1[...]
        d = jnp.maximum(d, 0.0)
        dist = jnp.dot(d.astype(jnp.bfloat16), wd2[...],
                       preferred_element_type=jnp.float32) + bd2[...]
        dist_ref[0] = jnp.broadcast_to(dist, (1, LANE))  # lane-dense store

        # fc chain: (Dropout=identity) Linear, then [ReLU, Linear]*, Sigmoid
        h = embb
        for j in range(n_fc):
            if j > 0:
                h = jnp.maximum(h, 0.0)
            h = jnp.dot(h.astype(jnp.bfloat16), fc[2 * j][...],
                        preferred_element_type=jnp.float32) + fc[2 * j + 1][...]
        pred_ref[0] = jnp.broadcast_to(1.0 / (1.0 + jnp.exp(-h)), (1, LANE))

    return kernel


def encoder_attpool_head(feats, enh_idx, prom_idx, params, cfg):
    B, S, Dpad = feats.shape
    D = cfg["cnn_channels"][-1]
    H = cfg["num_heads"]
    n_layers = len(params["enc"])
    n_fc = len(params["fc_w"])
    Fpad = params["enc"][0]["w_ff1"].shape[1]
    da_pad = params["w_att1"].shape[1]
    r = params["w_att2"].shape[1]

    enc_keys = ("w_qkv", "b_qkv", "w_o", "b_o", "ln1_g", "ln1_b",
                "w_ff1", "b_ff1", "w_ff2", "b_ff2", "ln2_g", "ln2_b")
    args = [params["pos_table"]]
    for lp in params["enc"]:
        args += [lp[k] for k in enc_keys]
    args += [params["w_att1"], params["b_att1"], params["w_att2"], params["b_att2"]]
    args += [params["fcd_w1"], params["fcd_b1"], params["fcd_w2"], params["fcd_b2"]]
    for w, bb in zip(params["fc_w"], params["fc_b"]):
        args += [w, bb]

    in_specs = [pl.BlockSpec((1, S, Dpad), lambda b, e, p: (b, 0, 0))]
    in_specs += [pl.BlockSpec(a.shape, lambda b, e, p: (0, 0)) for a in args]

    Dhp = Dpad // H
    per_layer = (2 * S * Dpad * 3 * Dpad + 4 * H * S * S * Dhp
                 + 2 * S * Dpad * Dpad + 4 * S * Dpad * Fpad)
    flops = B * (n_layers * per_layer + 2 * S * Dpad * da_pad
                 + 2 * S * da_pad * r + 2 * r * S * Dpad
                 + 2 * 4 * Dpad * (params["fc_w"][0].shape[1] + D))
    trans = B * (n_layers * (H * S * S + S) + S * (da_pad + r) + 2)
    cost = pl.CostEstimate(flops=int(flops), transcendentals=int(trans),
                           bytes_accessed=_nbytes([feats]) + _nbytes(args)
                           + 2 * B * LANE * 4)

    grid_spec = pltpu.PrefetchScalarGridSpec(
        num_scalar_prefetch=2,
        grid=(B,),
        in_specs=in_specs,
        out_specs=[pl.BlockSpec((1, 1, LANE), lambda b, e, p: (b, 0, 0)),
                   pl.BlockSpec((1, 1, LANE), lambda b, e, p: (b, 0, 0))],
        scratch_shapes=[pltpu.VMEM((S, Dpad), jnp.float32)],
    )
    pred, dist = pl.pallas_call(
        make_encoder_head_kernel(S, D, Dpad, H, n_layers, n_fc),
        out_shape=(jax.ShapeDtypeStruct((B, 1, LANE), jnp.float32),
                   jax.ShapeDtypeStruct((B, 1, LANE), jnp.float32)),
        grid_spec=grid_spec,
        compiler_params=pltpu.CompilerParams(
            dimension_semantics=("parallel",),
            vmem_limit_bytes=_VMEM_LIMIT),
        cost_estimate=cost,
    )(enh_idx, prom_idx, feats, *args)
    return pred[:, 0, :1], dist[:, 0, :1]


# ---------------------------------------------------------------------------
# Full forward (thin JAX glue; all hot paths inside the two fused kernels)
# ---------------------------------------------------------------------------
def transepi_forward(params, feats_bcl, enh_idx, prom_idx, cfg):
    # feats_bcl: (B, in_dim, seq_len) — PyTorch Conv1d layout.
    x = jnp.transpose(feats_bcl, (0, 2, 1)).astype(jnp.float32)
    B, L, Cin = x.shape
    x = jnp.pad(x, ((0, 0), (0, 0), (0, LANE - Cin)))    # one-time lane pad of input
    e = enh_idx.astype(jnp.int32).reshape(B)
    p = prom_idx.astype(jnp.int32).reshape(B)
    for pool in cfg["cnn_pool"]:
        e = e // pool                  # torch.div(..., rounding_mode='trunc')
        p = p // pool
    feats = cnn_stack(x, params["cnn"], cfg)             # (B, S, 128)
    S = feats.shape[1]
    e = jnp.clip(e, 0, S - 1)          # guard the in-kernel VMEM row gather
    p = jnp.clip(p, 0, S - 1)
    pred, _dist = encoder_attpool_head(feats, e, p, params, cfg)
    # The PyTorch module also computes fc_dist but returns only the prediction.
    return pred


# ---------------------------------------------------------------------------
# Deterministic "real-shaped" parameter init (matching module shapes)
# ---------------------------------------------------------------------------
def init_params(key, cfg):
    keys = iter(jax.random.split(key, 64))

    def nrm(shape, s=0.05):
        return jax.random.normal(next(keys), shape, jnp.float32) * s

    C, K, P = cfg["cnn_channels"], cfg["cnn_sizes"], cfg["cnn_pool"]
    params = {"cnn": []}
    cin = cfg["in_dim"]
    bn_eps = 1e-5
    for cout, k in zip(C, K):
        w = nrm((k, cin, cout), 0.1)
        b = nrm((cout,), 0.05)
        gamma = 1.0 + nrm((cout,), 0.05)
        beta = nrm((cout,), 0.05)
        run_mean = jnp.zeros((cout,))
        run_var = jnp.ones((cout,))
        scale = gamma / jnp.sqrt(run_var + bn_eps)      # BN eval folded
        shift = (b - run_mean) * scale + beta
        params["cnn"].append({"w": w,
                              "scale": scale.reshape(1, cout),
                              "shift": shift.reshape(1, cout)})
        cin = cout
    D = C[-1]
    seq_after = cfg["seq_len"]
    for pp in P:
        seq_after //= pp
    if cfg["pos_enc"]:
        pos = np.arange(seq_after)[:, None]
        j = np.arange(D)[None, :]
        angle = pos / np.power(10000.0, 2 * (j // 2) / D)
        table = np.zeros((seq_after, D), dtype=np.float32)
        table[:, 0::2] = np.sin(angle[:, 0::2])
        table[:, 1::2] = np.cos(angle[:, 1::2])
        params["pos_table"] = jnp.asarray(table)[None]
    else:
        params["pos_table"] = None
    F = cfg["d_inner"]
    params["enc"] = []
    for _ in range(cfg["enc_layers"]):
        params["enc"].append({
            "w_qkv": nrm((D, 3 * D)), "b_qkv": nrm((1, 3 * D), 0.02),
            "w_o": nrm((D, D)), "b_o": nrm((1, D), 0.02),
            "ln1_g": jnp.ones((1, D)), "ln1_b": jnp.zeros((1, D)),
            "w_ff1": nrm((D, F)), "b_ff1": nrm((1, F), 0.02),
            "w_ff2": nrm((F, D)), "b_ff2": nrm((1, D), 0.02),
            "ln2_g": jnp.ones((1, D)), "ln2_b": jnp.zeros((1, D)),
        })
    da, r = cfg["da"], cfg["r"]
    params["w_att1"] = nrm((D, da))
    params["b_att1"] = jnp.zeros((1, da))     # att_first.bias.data.fill_(0)
    params["w_att2"] = nrm((da, r))
    params["b_att2"] = jnp.zeros((1, r))      # att_second.bias.data.fill_(0)
    fc = list(cfg["fc"])
    if fc[-1] != 1:
        fc.append(1)
    dims = [4 * D] + fc
    params["fc_w"] = [nrm((dims[i], dims[i + 1])) for i in range(len(dims) - 1)]
    params["fc_b"] = [nrm((1, dims[i + 1]), 0.02) for i in range(len(dims) - 1)]
    params["fcd_w1"] = nrm((4 * D, D))
    params["fcd_b1"] = nrm((1, D), 0.02)
    params["fcd_w2"] = nrm((D, 1))
    params["fcd_b2"] = nrm((1, 1), 0.02)
    return params


# ---------------------------------------------------------------------------
# Lane-pad / bf16-cast / head-spread the real params into kernel layout.
# ---------------------------------------------------------------------------
def prepare_params(rp, cfg):
    D = cfg["cnn_channels"][-1]
    H = cfg["num_heads"]
    assert max([cfg["in_dim"]] + list(cfg["cnn_channels"])) <= LANE, \
        "channel dims > 128 would need multi-tile lanes"
    assert D % H == 0 and LANE % H == 0
    Dpad = LANE
    Dh, Dhp = D // H, Dpad // H
    assert Dh <= Dhp
    Fpad = _rup(cfg["d_inner"])
    da_pad = _rup(cfg["da"])
    r = cfg["r"]

    out = {"cnn": [], "enc": []}
    for blk in rp["cnn"]:
        K, Cin, Cout = blk["w"].shape
        w = jnp.zeros((K, LANE, LANE), jnp.float32).at[:, :Cin, :Cout].set(blk["w"])
        out["cnn"].append({
            "w": w.reshape(K * LANE, LANE).astype(jnp.bfloat16),
            # zero padding keeps the padded output lanes exactly zero
            "scale": _pad2(blk["scale"], 1, LANE),
            "shift": _pad2(blk["shift"], 1, LANE),
        })

    seq_after = cfg["seq_len"]
    for p in cfg["cnn_pool"]:
        seq_after //= p
    if rp["pos_table"] is not None:
        out["pos_table"] = _pad2(rp["pos_table"][0], seq_after, Dpad)
    else:
        out["pos_table"] = jnp.zeros((seq_after, Dpad), jnp.float32)

    def spread_cols(w):    # (rows, D) -> (rows, Dpad): head h at lanes [h*Dhp, +Dh)
        o = jnp.zeros((w.shape[0], Dpad), jnp.float32)
        for h in range(H):
            o = o.at[:, h * Dhp:h * Dhp + Dh].set(w[:, h * Dh:(h + 1) * Dh])
        return o

    def spread_rows(w):    # (D, cols) -> (Dpad, cols), same head spreading
        o = jnp.zeros((Dpad, w.shape[1]), jnp.float32)
        for h in range(H):
            o = o.at[h * Dhp:h * Dhp + Dh, :].set(w[h * Dh:(h + 1) * Dh, :])
        return o

    for lp in rp["enc"]:
        wq, wk, wv = (lp["w_qkv"][:, :D], lp["w_qkv"][:, D:2 * D], lp["w_qkv"][:, 2 * D:])
        bq, bk, bv = (lp["b_qkv"][:, :D], lp["b_qkv"][:, D:2 * D], lp["b_qkv"][:, 2 * D:])
        w_qkv = jnp.concatenate(
            [_pad2(spread_cols(w), Dpad, Dpad) for w in (wq, wk, wv)], axis=1)
        b_qkv = jnp.concatenate([spread_cols(bb) for bb in (bq, bk, bv)], axis=1)
        out["enc"].append({
            "w_qkv": w_qkv.astype(jnp.bfloat16),
            "b_qkv": b_qkv,
            "w_o": _pad2(spread_rows(lp["w_o"]), Dpad, Dpad).astype(jnp.bfloat16),
            "b_o": _pad2(lp["b_o"], 1, Dpad),
            "ln1_g": _pad2(lp["ln1_g"], 1, Dpad),
            "ln1_b": _pad2(lp["ln1_b"], 1, Dpad),
            "w_ff1": _pad2(lp["w_ff1"], Dpad, Fpad).astype(jnp.bfloat16),
            "b_ff1": _pad2(lp["b_ff1"], 1, Fpad),
            "w_ff2": _pad2(lp["w_ff2"], Fpad, Dpad).astype(jnp.bfloat16),
            "b_ff2": _pad2(lp["b_ff2"], 1, Dpad),
            "ln2_g": _pad2(lp["ln2_g"], 1, Dpad),
            "ln2_b": _pad2(lp["ln2_b"], 1, Dpad),
        })

    out["w_att1"] = _pad2(rp["w_att1"], Dpad, da_pad).astype(jnp.bfloat16)
    out["b_att1"] = _pad2(rp["b_att1"], 1, da_pad)
    out["w_att2"] = _pad2(rp["w_att2"], da_pad, r).astype(jnp.bfloat16)
    out["b_att2"] = rp["b_att2"]

    def expand_emb_rows(w):   # (4*D, cols) -> (4*Dpad, cols): emb is 4 lane blocks
        o = jnp.zeros((4 * Dpad, w.shape[1]), jnp.float32)
        for blk in range(4):
            o = o.at[blk * Dpad:blk * Dpad + D, :].set(w[blk * D:(blk + 1) * D, :])
        return o

    out["fc_w"] = ([expand_emb_rows(rp["fc_w"][0]).astype(jnp.bfloat16)]
                   + [w.astype(jnp.bfloat16) for w in rp["fc_w"][1:]])
    out["fc_b"] = list(rp["fc_b"])
    out["fcd_w1"] = expand_emb_rows(rp["fcd_w1"]).astype(jnp.bfloat16)
    out["fcd_b1"] = rp["fcd_b1"]
    out["fcd_w2"] = rp["fcd_w2"].astype(jnp.bfloat16)
    out["fcd_b2"] = rp["fcd_b2"]
    return out


# TODO(synk): variable-length masking path (feats passed as (feats, length))
# and return_att=True are not implemented; eval-mode Dropout/BatchNorm only.
if __name__ == "__main__":
    cfg = dict(in_dim=8, cnn_channels=[16, 32], cnn_sizes=[5, 3], cnn_pool=[4, 2],
               enc_layers=2, num_heads=4, d_inner=64, da=16, r=4, att_C=0.2,
               fc=[32, 16], fc_dropout=0.1, seq_len=64, pos_enc=True)
    key = jax.random.PRNGKey(0)
    pkey, xkey = jax.random.split(key)
    real_params = init_params(pkey, cfg)
    params = prepare_params(real_params, cfg)
    B = 2
    feats = jax.random.normal(xkey, (B, cfg["in_dim"], cfg["seq_len"]), jnp.float32)
    enh_idx = jnp.array([3, 40], dtype=jnp.int32)
    prom_idx = jnp.array([60, 10], dtype=jnp.int32)
    out = transepi_forward(params, feats, enh_idx, prom_idx, cfg)
    out = jax.block_until_ready(out)
    assert out.shape == (B, 1)
    assert bool(jnp.all(jnp.isfinite(out)))
    print("KERNEL_OK")
</pallas_src>

<mosaic_0001>
module attributes {stable_mosaic.version = 11 : i64} {
  func.func @kernel(%arg0: i32, %arg1: memref<1x64x128xf32, #tpu.memory_space<vmem>>, %arg2: memref<640x128xbf16, #tpu.memory_space<vmem>>, %arg3: memref<1x128xf32, #tpu.memory_space<vmem>>, %arg4: memref<1x128xf32, #tpu.memory_space<vmem>>, %arg5: memref<384x128xbf16, #tpu.memory_space<vmem>>, %arg6: memref<1x128xf32, #tpu.memory_space<vmem>>, %arg7: memref<1x128xf32, #tpu.memory_space<vmem>>, %arg8: memref<1x8x128xf32, #tpu.memory_space<vmem>>) attributes {dimension_semantics = [#tpu.dimension_semantics<parallel>], iteration_bounds = array<i64: 2>, scalar_prefetch = 0 : i64, scratch_operands = 0 : i64, tpu.core_type = #tpu.core_type<tc>, window_params = [{transform_indices = @transform_0, window_bounds = array<i64: 1, 64, 128>}, {pipeline_mode = #tpu.pipeline_mode<synchronous>, transform_indices = @transform_1, window_bounds = array<i64: 640, 128>}, {pipeline_mode = #tpu.pipeline_mode<synchronous>, transform_indices = @transform_2, window_bounds = array<i64: 1, 128>}, {pipeline_mode = #tpu.pipeline_mode<synchronous>, transform_indices = @transform_3, window_bounds = array<i64: 1, 128>}, {pipeline_mode = #tpu.pipeline_mode<synchronous>, transform_indices = @transform_4, window_bounds = array<i64: 384, 128>}, {pipeline_mode = #tpu.pipeline_mode<synchronous>, transform_indices = @transform_5, window_bounds = array<i64: 1, 128>}, {pipeline_mode = #tpu.pipeline_mode<synchronous>, transform_indices = @transform_6, window_bounds = array<i64: 1, 128>}, {transform_indices = @transform_7, window_bounds = array<i64: 1, 8, 128>}]} {
    %c0 = arith.constant 0 : index
    %c0_0 = arith.constant 0 : index
    %c0_1 = arith.constant 0 : index
    %0 = vector.load %arg1[%c0, %c0_0, %c0_1] : memref<1x64x128xf32, #tpu.memory_space<vmem>>, vector<1x64x128xf32>
    %1 = vector.shape_cast %0 : vector<1x64x128xf32> to vector<64x128xf32>
    %c2_i32 = arith.constant 2 : i32
    %2 = tpu.dynamic_rotate %1 by %c2_i32 dim 0 : vector<64x128xf32>, i32 -> vector<64x128xf32>
    %3 = tpu.iota {dimensions = array<i32: 0>} : vector<64x128xi32>
    %c-2_i32 = arith.constant -2 : i32
    %4 = vector.broadcast %c-2_i32 : i32 to vector<64x128xi32>
    %5 = arith.addi %3, %4 : vector<64x128xi32>
    %c0_i32 = arith.constant 0 : i32
    %6 = vector.broadcast %c0_i32 : i32 to vector<64x128xi32>
    %7 = arith.cmpi sge, %5, %6 : vector<64x128xi32>
    %c-2_i32_2 = arith.constant -2 : i32
    %8 = vector.broadcast %c-2_i32_2 : i32 to vector<64x128xi32>
    %9 = arith.addi %3, %8 : vector<64x128xi32>
    %c64_i32 = arith.constant 64 : i32
    %10 = vector.broadcast %c64_i32 : i32 to vector<64x128xi32>
    %11 = arith.cmpi slt, %9, %10 : vector<64x128xi32>
    %12 = arith.andi %7, %11 : vector<64x128xi1>
    %cst = arith.constant 0.000000e+00 : f32
    %13 = vector.broadcast %cst : f32 to vector<64x128xf32>
    %14 = arith.select %12, %2, %13 : vector<64x128xi1>, vector<64x128xf32>
    %15 = arith.truncf %14 : vector<64x128xf32> to vector<64x128xbf16>
    %c1_i32 = arith.constant 1 : i32
    %16 = tpu.dynamic_rotate %1 by %c1_i32 dim 0 : vector<64x128xf32>, i32 -> vector<64x128xf32>
    %17 = tpu.iota {dimensions = array<i32: 0>} : vector<64x128xi32>
    %c-1_i32 = arith.constant -1 : i32
    %18 = vector.broadcast %c-1_i32 : i32 to vector<64x128xi32>
    %19 = arith.addi %17, %18 : vector<64x128xi32>
    %c0_i32_3 = arith.constant 0 : i32
    %20 = vector.broadcast %c0_i32_3 : i32 to vector<64x128xi32>
    %21 = arith.cmpi sge, %19, %20 : vector<64x128xi32>
    %c-1_i32_4 = arith.constant -1 : i32
    %22 = vector.broadcast %c-1_i32_4 : i32 to vector<64x128xi32>
    %23 = arith.addi %17, %22 : vector<64x128xi32>
    %c64_i32_5 = arith.constant 64 : i32
    %24 = vector.broadcast %c64_i32_5 : i32 to vector<64x128xi32>
    %25 = arith.cmpi slt, %23, %24 : vector<64x128xi32>
    %26 = arith.andi %21, %25 : vector<64x128xi1>
    %cst_6 = arith.constant 0.000000e+00 : f32
    %27 = vector.broadcast %cst_6 : f32 to vector<64x128xf32>
    %28 = arith.select %26, %16, %27 : vector<64x128xi1>, vector<64x128xf32>
    %29 = arith.truncf %28 : vector<64x128xf32> to vector<64x128xbf16>
    %30 = arith.truncf %1 : vector<64x128xf32> to vector<64x128xbf16>
    %c63_i32 = arith.constant 63 : i32
    %31 = tpu.dynamic_rotate %1 by %c63_i32 dim 0 : vector<64x128xf32>, i32 -> vector<64x128xf32>
    %32 = tpu.iota {dimensions = array<i32: 0>} : vector<64x128xi32>
    %c1_i32_7 = arith.constant 1 : i32
    %33 = vector.broadcast %c1_i32_7 : i32 to vector<64x128xi32>
    %34 = arith.addi %32, %33 : vector<64x128xi32>
    %c0_i32_8 = arith.constant 0 : i32
    %35 = vector.broadcast %c0_i32_8 : i32 to vector<64x128xi32>
    %36 = arith.cmpi sge, %34, %35 : vector<64x128xi32>
    %c1_i32_9 = arith.constant 1 : i32
    %37 = vector.broadcast %c1_i32_9 : i32 to vector<64x128xi32>
    %38 = arith.addi %32, %37 : vector<64x128xi32>
    %c64_i32_10 = arith.constant 64 : i32
    %39 = vector.broadcast %c64_i32_10 : i32 to vector<64x128xi32>
    %40 = arith.cmpi slt, %38, %39 : vector<64x128xi32>
    %41 = arith.andi %36, %40 : vector<64x128xi1>
    %cst_11 = arith.constant 0.000000e+00 : f32
    %42 = vector.broadcast %cst_11 : f32 to vector<64x128xf32>
    %43 = arith.select %41, %31, %42 : vector<64x128xi1>, vector<64x128xf32>
    %44 = arith.truncf %43 : vector<64x128xf32> to vector<64x128xbf16>
    %c62_i32 = arith.constant 62 : i32
    %45 = tpu.dynamic_rotate %1 by %c62_i32 dim 0 : vector<64x128xf32>, i32 -> vector<64x128xf32>
    %46 = tpu.iota {dimensions = array<i32: 0>} : vector<64x128xi32>
    %c2_i32_12 = arith.constant 2 : i32
    %47 = vector.broadcast %c2_i32_12 : i32 to vector<64x128xi32>
    %48 = arith.addi %46, %47 : vector<64x128xi32>
    %c0_i32_13 = arith.constant 0 : i32
    %49 = vector.broadcast %c0_i32_13 : i32 to vector<64x128xi32>
    %50 = arith.cmpi sge, %48, %49 : vector<64x128xi32>
    %c2_i32_14 = arith.constant 2 : i32
    %51 = vector.broadcast %c2_i32_14 : i32 to vector<64x128xi32>
    %52 = arith.addi %46, %51 : vector<64x128xi32>
    %c64_i32_15 = arith.constant 64 : i32
    %53 = vector.broadcast %c64_i32_15 : i32 to vector<64x128xi32>
    %54 = arith.cmpi slt, %52, %53 : vector<64x128xi32>
    %55 = arith.andi %50, %54 : vector<64x128xi1>
    %cst_16 = arith.constant 0.000000e+00 : f32
    %56 = vector.broadcast %cst_16 : f32 to vector<64x128xf32>
    %57 = arith.select %55, %45, %56 : vector<64x128xi1>, vector<64x128xf32>
    %58 = arith.truncf %57 : vector<64x128xf32> to vector<64x128xbf16>
    %59 = tpu.concatenate %15, %29, %30, %44, %58 in 1 : vector<64x128xbf16>, vector<64x128xbf16>, vector<64x128xbf16>, vector<64x128xbf16>, vector<64x128xbf16> -> vector<64x640xbf16>
    %c0_17 = arith.constant 0 : index
    %c0_18 = arith.constant 0 : index
    %60 = vector.load %arg2[%c0_17, %c0_18] : memref<640x128xbf16, #tpu.memory_space<vmem>>, vector<640x128xbf16>
    %cst_19 = arith.constant dense<0.000000e+00> : vector<64x128xf32>
    %61 = tpu.matmul %59, %60, %cst_19 {dimension_numbers = #tpu.dot_dimension_numbers<[1], [0], [0], [1], [0, 0, 1, 1], [], []>} : vector<64x640xbf16>, vector<640x128xbf16>, vector<64x128xf32> -> vector<64x128xf32>
    %c0_20 = arith.constant 0 : index
    %c0_21 = arith.constant 0 : index
    %62 = vector.load %arg3[%c0_20, %c0_21] : memref<1x128xf32, #tpu.memory_space<vmem>>, vector<1x128xf32>
    %63 = vector.broadcast %62 : vector<1x128xf32> to vector<64x128xf32>
    %64 = arith.mulf %61, %63 : vector<64x128xf32>
    %c0_22 = arith.constant 0 : index
    %c0_23 = arith.constant 0 : index
    %65 = vector.load %arg4[%c0_22, %c0_23] : memref<1x128xf32, #tpu.memory_space<vmem>>, vector<1x128xf32>
    %66 = vector.broadcast %65 : vector<1x128xf32> to vector<64x128xf32>
    %67 = arith.addf %64, %66 : vector<64x128xf32>
    %cst_24 = arith.constant 0.000000e+00 : f32
    %68 = vector.broadcast %cst_24 : f32 to vector<64x128xf32>
    %69 = arith.cmpf oge, %67, %68 : vector<64x128xf32>
    %cst_25 = arith.constant 0.00999999977 : f32
    %70 = vector.broadcast %cst_25 : f32 to vector<64x128xf32>
    %71 = arith.mulf %70, %67 : vector<64x128xf32>
    %72 = arith.select %69, %67, %71 : vector<64x128xi1>, vector<64x128xf32>
    %73 = vector.shape_cast %72 : vector<64x128xf32> to vector<16x4x128xf32>
    %cst_26 = arith.constant dense<0xFF800000> : vector<16x128xf32>
    %74 = vector.multi_reduction <maximumf>, %73, %cst_26 [1] : vector<16x4x128xf32> to vector<16x128xf32>
    %c1_i32_27 = arith.constant 1 : i32
    %75 = tpu.dynamic_rotate %74 by %c1_i32_27 dim 0 : vector<16x128xf32>, i32 -> vector<16x128xf32>
    %76 = tpu.iota {dimensions = array<i32: 0>} : vector<16x128xi32>
    %c-1_i32_28 = arith.constant -1 : i32
    %77 = vector.broadcast %c-1_i32_28 : i32 to vector<16x128xi32>
    %78 = arith.addi %76, %77 : vector<16x128xi32>
    %c0_i32_29 = arith.constant 0 : i32
    %79 = vector.broadcast %c0_i32_29 : i32 to vector<16x128xi32>
    %80 = arith.cmpi sge, %78, %79 : vector<16x128xi32>
    %c-1_i32_30 = arith.constant -1 : i32
    %81 = vector.broadcast %c-1_i32_30 : i32 to vector<16x128xi32>
    %82 = arith.addi %76, %81 : vector<16x128xi32>
    %c16_i32 = arith.constant 16 : i32
    %83 = vector.broadcast %c16_i32 : i32 to vector<16x128xi32>
    %84 = arith.cmpi slt, %82, %83 : vector<16x128xi32>
    %85 = arith.andi %80, %84 : vector<16x128xi1>
    %cst_31 = arith.constant 0.000000e+00 : f32
    %86 = vector.broadcast %cst_31 : f32 to vector<16x128xf32>
    %87 = arith.select %85, %75, %86 : vector<16x128xi1>, vector<16x128xf32>
    %88 = arith.truncf %87 : vector<16x128xf32> to vector<16x128xbf16>
    %89 = arith.truncf %74 : vector<16x128xf32> to vector<16x128xbf16>
    %c15_i32 = arith.constant 15 : i32
    %90 = tpu.dynamic_rotate %74 by %c15_i32 dim 0 : vector<16x128xf32>, i32 -> vector<16x128xf32>
    %91 = tpu.iota {dimensions = array<i32: 0>} : vector<16x128xi32>
    %c1_i32_32 = arith.constant 1 : i32
    %92 = vector.broadcast %c1_i32_32 : i32 to vector<16x128xi32>
    %93 = arith.addi %91, %92 : vector<16x128xi32>
    %c0_i32_33 = arith.constant 0 : i32
    %94 = vector.broadcast %c0_i32_33 : i32 to vector<16x128xi32>
    %95 = arith.cmpi sge, %93, %94 : vector<16x128xi32>
    %c1_i32_34 = arith.constant 1 : i32
    %96 = vector.broadcast %c1_i32_34 : i32 to vector<16x128xi32>
    %97 = arith.addi %91, %96 : vector<16x128xi32>
    %c16_i32_35 = arith.constant 16 : i32
    %98 = vector.broadcast %c16_i32_35 : i32 to vector<16x128xi32>
    %99 = arith.cmpi slt, %97, %98 : vector<16x128xi32>
    %100 = arith.andi %95, %99 : vector<16x128xi1>
    %cst_36 = arith.constant 0.000000e+00 : f32
    %101 = vector.broadcast %cst_36 : f32 to vector<16x128xf32>
    %102 = arith.select %100, %90, %101 : vector<16x128xi1>, vector<16x128xf32>
    %103 = arith.truncf %102 : vector<16x128xf32> to vector<16x128xbf16>
    %104 = tpu.concatenate %88, %89, %103 in 1 : vector<16x128xbf16>, vector<16x128xbf16>, vector<16x128xbf16> -> vector<16x384xbf16>
    %c0_37 = arith.constant 0 : index
    %c0_38 = arith.constant 0 : index
    %105 = vector.load %arg5[%c0_37, %c0_38] : memref<384x128xbf16, #tpu.memory_space<vmem>>, vector<384x128xbf16>
    %cst_39 = arith.constant dense<0.000000e+00> : vector<16x128xf32>
    %106 = tpu.matmul %104, %105, %cst_39 {dimension_numbers = #tpu.dot_dimension_numbers<[1], [0], [0], [1], [0, 0, 1, 1], [], []>} : vector<16x384xbf16>, vector<384x128xbf16>, vector<16x128xf32> -> vector<16x128xf32>
    %c0_40 = arith.constant 0 : index
    %c0_41 = arith.constant 0 : index
    %107 = vector.load %arg6[%c0_40, %c0_41] : memref<1x128xf32, #tpu.memory_space<vmem>>, vector<1x128xf32>
    %108 = vector.broadcast %107 : vector<1x128xf32> to vector<16x128xf32>
    %109 = arith.mulf %106, %108 : vector<16x128xf32>
    %c0_42 = arith.constant 0 : index
    %c0_43 = arith.constant 0 : index
    %110 = vector.load %arg7[%c0_42, %c0_43] : memref<1x128xf32, #tpu.memory_space<vmem>>, vector<1x128xf32>
    %111 = vector.broadcast %110 : vector<1x128xf32> to vector<16x128xf32>
    %112 = arith.addf %109, %111 : vector<16x128xf32>
    %cst_44 = arith.constant 0.000000e+00 : f32
    %113 = vector.broadcast %cst_44 : f32 to vector<16x128xf32>
    %114 = arith.cmpf oge, %112, %113 : vector<16x128xf32>
    %cst_45 = arith.constant 0.00999999977 : f32
    %115 = vector.broadcast %cst_45 : f32 to vector<16x128xf32>
    %116 = arith.mulf %115, %112 : vector<16x128xf32>
    %117 = arith.select %114, %112, %116 : vector<16x128xi1>, vector<16x128xf32>
    %118 = vector.shape_cast %117 : vector<16x128xf32> to vector<8x2x128xf32>
    %cst_46 = arith.constant dense<0xFF800000> : vector<8x128xf32>
    %119 = vector.multi_reduction <maximumf>, %118, %cst_46 [1] : vector<8x2x128xf32> to vector<8x128xf32>
    %c0_47 = arith.constant 0 : index
    %c0_48 = arith.constant 0 : index
    %c0_49 = arith.constant 0 : index
    %120 = vector.load %arg8[%c0_47, %c0_48, %c0_49] : memref<1x8x128xf32, #tpu.memory_space<vmem>>, vector<1x8x128xf32>
    %121 = vector.shape_cast %120 : vector<1x8x128xf32> to vector<8x128xf32>
    %122 = vector.shape_cast %119 : vector<8x128xf32> to vector<1x8x128xf32>
    tpu.vector_store %arg8[%c0_47, %c0_48, %c0_49], %122 {strides = array<i32>} : memref<1x8x128xf32, #tpu.memory_space<vmem>>, vector<1x8x128xf32>,
    return
  }
  func.func @transform_0(%arg0: i32) -> (i32, i32, i32) {
    %c0_i32 = arith.constant 0 : i32
    %c0_i32_0 = arith.constant 0 : i32
    %c0_i32_1 = arith.constant 0 : i32
    return %arg0, %c0_i32, %c0_i32_0 : i32, i32, i32
  }
  func.func @transform_1(%arg0: i32) -> (i32, i32) {
    %c0_i32 = arith.constant 0 : i32
    %c0_i32_0 = arith.constant 0 : i32
    %c0_i32_1 = arith.constant 0 : i32
    return %c0_i32, %c0_i32_0 : i32, i32
  }
  func.func @transform_2(%arg0: i32) -> (i32, i32) {
    %c0_i32 = arith.constant 0 : i32
    %c0_i32_0 = arith.constant 0 : i32
    %c0_i32_1 = arith.constant 0 : i32
    return %c0_i32, %c0_i32_0 : i32, i32
  }
  func.func @transform_3(%arg0: i32) -> (i32, i32) {
    %c0_i32 = arith.constant 0 : i32
    %c0_i32_0 = arith.constant 0 : i32
    %c0_i32_1 = arith.constant 0 : i32
    return %c0_i32, %c0_i32_0 : i32, i32
  }
  func.func @transform_4(%arg0: i32) -> (i32, i32) {
    %c0_i32 = arith.constant 0 : i32
    %c0_i32_0 = arith.constant 0 : i32
    %c0_i32_1 = arith.constant 0 : i32
    return %c0_i32, %c0_i32_0 : i32, i32
  }
  func.func @transform_5(%arg0: i32) -> (i32, i32) {
    %c0_i32 = arith.constant 0 : i32
    %c0_i32_0 = arith.constant 0 : i32
    %c0_i32_1 = arith.constant 0 : i32
    return %c0_i32, %c0_i32_0 : i32, i32
  }
  func.func @transform_6(%arg0: i32) -> (i32, i32) {
    %c0_i32 = arith.constant 0 : i32
    %c0_i32_0 = arith.constant 0 : i32
    %c0_i32_1 = arith.constant 0 : i32
    return %c0_i32, %c0_i32_0 : i32, i32
  }
  func.func @transform_7(%arg0: i32) -> (i32, i32, i32) {
    %c0_i32 = arith.constant 0 : i32
    %c0_i32_0 = arith.constant 0 : i32
    %c0_i32_1 = arith.constant 0 : i32
    return %arg0, %c0_i32, %c0_i32_0 : i32, i32, i32
  }
}

</mosaic_0001>

<bundles_post_ra>
// kernel: tpu_custom_call.1
= control target key start
LH: loop header
LB: loop body
LE: loop exit
PB: predicated region body
PF: predicated region fallthrough
CT: control target
= control target key end

     0   :  { %12 = vsyncpa [#allocation3], 0  ;;  %s3136_s0 = inlined_call_operand.hbm [shape: f32[2,64,128], index: 0, kind: input, shape index: {}]   ;;  %s3137_s1 = inlined_call_operand.hbm [shape: bf16[640,128], index: 1, kind: input, shape index: {}]   ;;  %s3138_s2 = inlined_call_operand.vmem [shape: f32[1,128], index: 2, kind: input, shape index: {}]   ;;  %s3139_s3 = inlined_call_operand.vmem [shape: f32[1,128], index: 3, kind: input, shape index: {}]   ;;  %s3140_s4 = inlined_call_operand.hbm [shape: bf16[384,128], index: 4, kind: input, shape index: {}]   ;;  %s3141_s5 = inlined_call_operand.vmem [shape: f32[1,128], index: 5, kind: input, shape index: {}]   ;;  %s3142_s6 = inlined_call_operand.vmem [shape: f32[1,128], index: 6, kind: input, shape index: {}]   ;;  %s3143_s7 = inlined_call_operand.hbm [shape: f32[2,8,128], index: 7, kind: output, shape index: {}]  }
   0x1   :  { %14 = vsyncpa [#allocation3 + $0x1], 0 }
   0x2   :  { %15 = vsyncpa [#allocation6], 0 }
   0x3   :  { %16 = vsyncpa [#allocation4], 0 }
   0x4   :  { %18 = vsyncpa [#allocation4 + $0x1], 0  ;;  %s2562_s24 = smov 0   ;;  %s2564_s25 = smov 0  }
   0x5   :  { %s2566_s26 = smov 0   ;;  %s2568_s27 = smov 0  }
   0x6 LB: > { %s2583_s28 = sadd.s32 4294967295, %s2508_s27   ;;  %s1942_s29 = sadd.s32 4294967294, %s2508_s27   ;;  %s2508_s27 = sphi %s2568_s27, %s3167_s27   ;;  %s2504_s26 = sphi %s2566_s26, %s3166_s26   ;;  %s2500_s25 = sphi %s2564_s25, %s3165_s25   ;;  %s2496_s24 = sphi %s2562_s24, %s3164_s24  }
   0x7   : > { %p44_p0 = scmp.ne.s32.totalorder %s2500_s25, %s2496_s24  ;;  %p3144_p1 = scmp.eq.s32.totalorder %s2583_s28, 0 }
   0x8   : > { %p200_p3 = scmp.eq.s32.totalorder %s1942_s29, 1  ;;  %p1943_p5 = scmp.ge.s32.totalorder %s2508_s27, 1 }
   0x9   : > { %p2592_p4 = por %p3144_p1, %p44_p0  ;;  %p207_p7 = scmp.lt.s32.totalorder %s2508_s27, 3 }
   0xa   : > { %p2597_p6 = por %p200_p3, %p44_p0  ;;  %s2510_s10 = smov [#allocation5]  }
   0xb   : > { %s3147_s30 = scalar_select %p2592_p4, 1, 0 }
   0xc   : > { %s3148_s8 = scalar_select %p2597_p6, 1, 0 }
   0xd   : > { %p2602_p8 = pnand %p1943_p5, %p207_p7  ;;  %s219_s11 = sshll.u32 %s2510_s10, 4  ;;  %s2606_s11 = int_to_ptr.vmem [resolvable:$true] %s219_s11 }
   0xe   : > { %s2511_s13 = smov [#allocation7]   ;;  %s2352_s17 = scalar_lea.hbm %s3137_s1, 5120 }
   0xf   : > { %p2225_p9 = pneg %p2602_p8  ;;  %s238_s14 = sshll.u32 %s2511_s13, 4  ;;  %s2617_s14 = int_to_ptr.vmem [resolvable:$true] %s238_s14 }
  0x10   : > { %p2353_p12 = scmp.ne.s32.totalorder %s3137_s1, %s2352_s17  ;;  %p2359_p5 = scmp.lt.u32.totalorder %s2352_s17, %s3137_s1 }
  0x11   : > { %p2613_p11 = pnand %p2225_p9, %p3144_p1 }
  0x13   : > { %p2354_p13 = pneg %p2613_p11 }
  0x15   : > { %p2355_p0 = pnand %p2354_p13, %p2353_p12 }
  0x17   : > { %p2356_p3 = pneg %p2355_p0 }
  0x19   : > { %p2361_p7 = pnand %p2359_p5, %p2356_p3 }
  0x1b   : > { %2364 = shalt.err (!%p2361_p7)
}
  0x1c   : > { %s2365_s22 = scalar_lea.vmem %s2606_s11, 5120  ;;  %p2373_p2 = scmp.lt.s32.totalorder %s2606_s11, %s2606_s11 }
  0x1d   : > { %p2366_p9 = scmp.ne.s32.totalorder %s2606_s11, %s2365_s22  ;;  %p2374_p12 = scmp.lt.s32.totalorder %s2365_s22, %s2365_s22 }
  0x1f   : > { %p2368_p10 = pnand %p2366_p9, %p2354_p13  ;;  %p2375_p0 = por %p2374_p12, %p2373_p2 }
  0x21   : > { %p2369_p1 = pneg %p2368_p10 }
  0x23   : > { %p2376_p6 = pnand %p2375_p0, %p2369_p1 }
  0x25   : > { %2379 = shalt.err (!%p2376_p6)
}
  0x26   : > { %s2512_s23 = smov 64   ;;  %s2513_s29 = smov 4  }
  0x27   : > { %2228 = dma.hbm_to_vmem [thread:$0]  (!%p2613_p11), %s3137_s1, 5120, %s2606_s11, [#allocation6], %s2512_s23, %s2512_s23, %s2513_s29  }
  0x28   : > { %s2380_s17 = scalar_lea.hbm %s3140_s4, 3072 }
  0x29   : > { %p2381_p2 = scmp.ne.s32.totalorder %s3140_s4, %s2380_s17  ;;  %p2387_p10 = scmp.lt.u32.totalorder %s2380_s17, %s3140_s4 }
  0x2b   : > { %p2383_p1 = pnand %p2381_p2, %p2354_p13 }
  0x2d   : > { %p2384_p6 = pneg %p2383_p1 }
  0x2f   : > { %p2389_p3 = pnand %p2387_p10, %p2384_p6 }
  0x31   : > { %2392 = shalt.err (!%p2389_p3)
}
  0x32   : > { %s2393_s11 = scalar_lea.vmem %s2617_s14, 3072  ;;  %p2401_p12 = scmp.lt.s32.totalorder %s2617_s14, %s2617_s14 }
  0x33   : > { %p2394_p5 = scmp.ne.s32.totalorder %s2617_s14, %s2393_s11  ;;  %p2402_p0 = scmp.lt.s32.totalorder %s2393_s11, %s2393_s11 }
  0x35   : > { %p2396_p7 = pnand %p2394_p5, %p2354_p13  ;;  %p2403_p2 = por %p2402_p0, %p2401_p12 }
  0x37   : > { %p2397_p9 = pneg %p2396_p7 }
  0x39   : > { %p2404_p1 = pnand %p2403_p2, %p2397_p9 }
  0x3b   : > { %2407 = shalt.err (!%p2404_p1)
}
  0x3c   : > { %2231 = dma.hbm_to_vmem [thread:$0]  (!%p2613_p11), %s3140_s4, 3072, %s2617_s14, [#allocation6], %s2512_s23, %s2512_s23, %s2513_s29  }
  0x3d   : > { %s2672_s13 = sadd.s32 1, %s2508_s27   ;;  %s31_s12 = sadd.s32 1, %s2504_s26 }
  0x3e   : > { %s28_s15 = ssub.s32 %s2508_s27, %s2672_s13  ;;  %p38_p13 = scmp.ne.s32.totalorder %s2504_s26, %s2500_s25 }
  0x3f   : > { %p29_p6 = scmp.eq.s32.totalorder %s28_s15, 0  ;;  %p39_p10 = scmp.eq.s32.totalorder %s2508_s27, 0 }
  0x40   : > { %p3151_p3 = scmp.eq.s32.totalorder %s2583_s28, 1  ;;  %p2242_p7 = scmp.lt.s32.totalorder %s2508_s27, 2 }
  0x41   : > { %s2688_s17 = scalar_select %p29_p6, %s2504_s26, %s31_s12  }
  0x42   : > { %p2682_p5 = por %p3151_p3, %p38_p13  ;;  %p40_p9 = por %p39_p10, %p38_p13 }
  0x43   : > { %s258_s18 = sand.u32 1, %s2504_s26   ;;  %s2045_s14 = sshll.u32 %s2508_s27, 10 }
  0x44   : > { %s3152_s16 = scalar_select %p2682_p5, 1, 0 }
  0x45   : > { %s1947_s19 = sshll.u32 %s258_s18, 6  ;;  %s2695_s20 = scalar_lea.hbm %s3136_s0, %s2045_s14 }
  0x46   : > { %s262_s21 = scalar_lea.vmem [#allocation2], %s1947_s19  ;;  %p2699_p11 = pnand %p2242_p7, %p40_p9 }
  0x47   : > { %s269_s11 = sshll.u32 %s262_s21, 4  ;;  %s2703_s10 = scalar_lea.sflag [#allocation3], %s258_s18  ;;  %s2697_s11 = int_to_ptr.vmem [resolvable:$true] %s269_s11 }
  0x48   : > { %s2408_s12 = scalar_lea.hbm %s2695_s20, 1024  ;;  %p2410_p0 = pneg %p2699_p11 }
  0x49   : > { %p2409_p12 = scmp.ne.s32.totalorder %s2695_s20, %s2408_s12  ;;  %s2413_s14 = scalar_lea.hbm %s3136_s0, 2048 }
  0x4a   : > { %p2414_p13 = scmp.lt.u32.totalorder %s2695_s20, %s3136_s0  ;;  %p2415_p6 = scmp.lt.u32.totalorder %s2413_s14, %s2408_s12 }
  0x4b   : > { %p2411_p2 = pnand %p2410_p0, %p2409_p12  ;;  %p2417_p3 = scmp.lt.u32.totalorder %s2408_s12, %s2695_s20 }
  0x4c   : > { %p2416_p10 = por %p2415_p6, %p2414_p13 }
  0x4d   : > { %p2412_p1 = pneg %p2411_p2 }
  0x4e   : > { %p2418_p7 = por %p2417_p3, %p2416_p10 }
  0x50   : > { %p2419_p9 = pnand %p2418_p7, %p2412_p1 }
  0x52   : > { %2422 = shalt.err (!%p2419_p9)
}
  0x53   : > { %s2423_s18 = scalar_lea.vmem %s2697_s11, 1024  ;;  %s2514_s21 = smov [#allocation2]  }
  0x54   : > { %p2424_p12 = scmp.ne.s32.totalorder %s2697_s11, %s2423_s18  ;;  %s2428_s15 = sshll.u32 %s2514_s21, 4  ;;  %s2429_s15 = int_to_ptr.vmem [resolvable:$false] %s2428_s15 }
  0x55   : > { %s2430_s19 = scalar_lea.vmem %s2429_s15, 2048  ;;  %p2431_p4 = scmp.lt.s32.totalorder %s2697_s11, %s2429_s15 }
  0x56   : > { %p2426_p2 = pnand %p2424_p12, %p2410_p0  ;;  %p2432_p13 = scmp.lt.s32.totalorder %s2430_s19, %s2423_s18 }
  0x58   : > { %p2427_p5 = pneg %p2426_p2  ;;  %p2433_p6 = por %p2432_p13, %p2431_p4 }
  0x5a   : > { %p2434_p10 = pnand %p2433_p6, %p2427_p5 }
  0x5c   : > { %2437 = shalt.err (!%p2434_p10)
}
  0x5d   : > { %s2515_s12 = smov 128   ;;  %s2516_s14 = smov 8  }
  0x5e   : > { %2235 = dma.hbm_to_vmem [thread:$0]  (!%p2699_p11), %s2695_s20, 1024, %s2697_s11, %s2703_s10, %s2515_s12, %s2515_s12, %s2516_s14  }
  0x5f   : > { %281 = sbr.rel (%p2602_p8) target bundleno = 716 (0x2cc), region = 48  ;;  %s2734_s23 = sand.u32 (!%p2602_p8), 1, %s2500_s25  }
  0x60   : > { %s1951_s29 = sshll.u32 (!%p2602_p8), %s2734_s23, 6  ;;  %s284_s18 = scalar_lea.sflag (!%p2602_p8), [#allocation3], %s2734_s23 }
  0x61   : > { %s2738_s21 = scalar_lea.vmem (!%p2602_p8), [#allocation2], %s1951_s29  ;;  %p3154_p4 = scmp.ne.s32.totalorder (!%p2602_p8), %s3147_s30, 0 }
  0x66   : > { %2483 = dma.done.wait (%p3154_p4), %s284_s18, 1024  }
  0x67   : > { %2485 = vsyncadd (%p3154_p4), %s284_s18, 4294966272  ;;  %p3155_p5 = scmp.eq.s32.totalorder %s2583_s28, 0 }
  0x69   : > { %2487 = dma.done.wait (%p3155_p5), [#allocation6], 8192   ;;  %p3156_p8 = pmov %p3155_p5 }
  0x6a   : > { %v2288_v0 = vld [vmem:[#allocation5 + $0x40] sm:$0xff]   ;;  %v2292_v4 = vld [vmem:[#allocation5 + $0x48] sm:$0xff]   ;;  %v2296_v8 = vld [vmem:[#allocation5 + $0x50] sm:$0xff]   ;;  %v343_v20 = vlaneseq  ;;  %vm2517_vm5 = vmmov 1   ;;  %vm2519_vm13 = vmmov 0   ;;  %vm1185_vm15 = vcmask 1043456  }
  0x6b   : > { %2489 = vsyncadd (%p3156_p8), [#allocation6], 4294959104  ;;  %v2289_v1 = vld [vmem:[#allocation5 + $0xc0] sm:$0xff]   ;;  %2046 = vmatprep.subr.bf16.mxu0 %v2288_v0  ;;  %v2293_v5 = vld [vmem:[#allocation5 + $0xc8] sm:$0xff]   ;;  %s1954_s12 = sshll.u32 %s2734_s23, 3  ;;  %s2042_s14 = sshll.u32 %s2583_s28, 7 }
  0x6c   : > { %v2290_v2 = vld [vmem:[#allocation5] sm:$0xff]   ;;  %2086 = vmatprep.subr.bf16.mxu1 %v2289_v1  ;;  %v2294_v6 = vld [vmem:[#allocation5 + $0x8] sm:$0xff]   ;;  %v2297_v9 = vld [vmem:[#allocation5 + $0xd0] sm:$0xff]   ;;  %v2748_v25 = vshrl.u32 %v343_v20, 7  ;;  %s325_s29 = scalar_lea.vmem [#allocation8], %s1954_s12  ;;  %s3091_s9 = scalar_lea.hbm %s3143_s7, %s2042_s14 }
  0x6d   : > { %v2291_v3 = vld [vmem:[#allocation5 + $0x80] sm:$0xff]   ;;  %2047 = vmatpush3.bf16.msra.mxu0 %v2290_v2  ;;  %v2295_v7 = vld [vmem:[#allocation5 + $0x88] sm:$0xff]   ;;  %v2298_v10 = vld [vmem:[#allocation5 + $0x10] sm:$0xff]   ;;  %s1853_s18 = sshll.u32 %s325_s29, 4  ;;  %s1840_s28 = scalar_lea.sflag [#allocation4], %s2734_s23  ;;  %s3093_s18 = int_to_ptr.vmem [resolvable:$true] %s1853_s18 }
  0x6e   : > { %2087 = vmatpush3.bf16.msra.mxu1 %v2291_v3  ;;  %2048 = vmatprep.subr.bf16.mxu0 %v2292_v4  ;;  %v2299_v11 = vld [vmem:[#allocation5 + $0x90] sm:$0xff]   ;;  %v2300_v12 = vld [vmem:[#allocation5 + $0x58] sm:$0xff]   ;;  %v2304_v16 = vld [vmem:[#allocation5 + $0x60] sm:$0xff]   ;;  %v422_v30 = vadd.s32 4294967295, %v2748_v25  ;;  %v361_v32 = vadd.s32 4294967294, %v2748_v25  ;;  %vm413_vm0 = vcmp.lt.s32.totalorder %v2748_v25, 1 }
  0x6f   : > { %2088 = vmatprep.subr.bf16.mxu1 %v2293_v5  ;;  %v2301_v13 = vld [vmem:[#allocation5 + $0xd8] sm:$0xff]   ;;  %v2305_v17 = vld [vmem:[#allocation5 + $0xe0] sm:$0xff]   ;;  %v2308_v21 = vld [vmem:[#allocation5 + $0x68] sm:$0xff]   ;;  %vm478_vm1 = vcmp.lt.s32.totalorder %v2748_v25, 7  ;;  %vm345_vm2 = vcmp.lt.s32.totalorder %v2748_v25, 2  ;;  %v2765_v39 = vadd.s32 56, %v2748_v25 }
  0x70   : > { %v2302_v14 = vld [vmem:[#allocation5 + $0x18] sm:$0xff]   ;;  %v2306_v18 = vld [vmem:[#allocation5 + $0x20] sm:$0xff]   ;;  %v2309_v22 = vld [vmem:[#allocation5 + $0xe8] sm:$0xff]   ;;  %vm430_vm3 = vcmp.ge.s32.totalorder %v422_v30, 0  ;;  %vm369_vm4 = vcmp.ge.s32.totalorder %v361_v32, 0  ;;  %vm539_vm9 = vcmp.lt.s32.totalorder %v2748_v25, 6 }
  0x71   : > { %2049 = vmatpush3.bf16.msra.mxu0 %v2294_v6  ;;  %v2303_v15 = vld [vmem:[#allocation5 + $0x98] sm:$0xff]   ;;  %v2307_v19 = vld [vmem:[#allocation5 + $0xa0] sm:$0xff]   ;;  %v2310_v23 = vld [vmem:[#allocation5 + $0x28] sm:$0xff]   ;;  %s2438_s20 = scalar_lea.vmem %s3093_s18, 128  ;;  %p3161_p0 = scmp.ne.s32.totalorder %s3152_s16, 0 }
  0x72   : > { %2089 = vmatpush3.bf16.msra.mxu1 %v2295_v7  ;;  %2050 = vmatprep.subr.bf16.mxu0 %v2296_v8  ;;  %v2311_v24 = vld [vmem:[#allocation5 + $0xa8] sm:$0xff]   ;;  %v2312_v26 = vld [vmem:[#allocation5 + $0x70] sm:$0xff]   ;;  %v2316_v31 = vld [vmem:[#allocation5 + $0x78] sm:$0xff]   ;;  %p2439_p11 = scmp.ne.s32.totalorder %s3093_s18, %s2438_s20  ;;  %s2521_s11 = smov [#allocation8]  }
  0x73   : > { %2090 = vmatprep.subr.bf16.mxu1 %v2297_v9  ;;  %v2313_v27 = vld [vmem:[#allocation5 + $0xf0] sm:$0xff]   ;;  %v2317_v33 = vld [vmem:[#allocation5 + $0xf8] sm:$0xff]   ;;  %v2756_v36 = vld [vmem:[%s2738_s21] sm:$0xff]  ;;  %s2442_s22 = sshll.u32 %s2521_s11, 4  ;;  %s2443_s22 = int_to_ptr.vmem [resolvable:$false] %s2442_s22 }
  0x74   : > { %v2314_v28 = vld [vmem:[#allocation5 + $0x30] sm:$0xff]   ;;  %v2318_v34 = vld [vmem:[#allocation5 + $0x38] sm:$0xff]   ;;  %v2759_v37 = vld [vmem:[%s2738_s21 + $0x8] sm:$0xff]  ;;  %v405_v40 = vrot.slane %v2756_v36, 7  ;;  %v470_v44 = vrot.slane %v2756_v36, 1  ;;  %v335_v48 = vrot.slane %v2756_v36, 6  ;;  %p2440_p1 = pnand %p2439_p11, %p3161_p0  ;;  %p2445_p7 = scmp.lt.s32.totalorder %s3093_s18, %s2443_s22 }
  0x75   : > { %2051 = vmatpush3.bf16.msra.mxu0 %v2298_v10  ;;  %v2315_v29 = vld [vmem:[#allocation5 + $0xb0] sm:$0xff]   ;;  %v2319_v35 = vld [vmem:[#allocation5 + $0xb8] sm:$0xff]   ;;  %v406_v41 = vrot.slane %v2759_v37, 7  ;;  %v2320_v45 = vld [vmem:[#allocation5 + $0x100] sm:$0xff]   ;;  %v471_v46 = vrot.slane %v2759_v37, 1  ;;  %v336_v49 = vrot.slane %v2759_v37, 6  ;;  %v466_v54 = vpack.c.bf16 %v2759_v37, %v2756_v36 }
  0x76   : > { %2091 = vmatpush3.bf16.msra.mxu1 %v2299_v11  ;;  %2052 = vmatprep.subr.bf16.mxu0 %v2300_v12  ;;  %v2762_v38 = vld [vmem:[%s2738_s21 + $0x38] sm:$0xff]  ;;  %v2771_v43 = vld [vmem:[%s2738_s21 + $0x10] sm:$0xff]  ;;  %vm2786_vm6 = vmpackc.low %vm2517_vm5, %vm430_vm3  ;;  %v494_v10 = vadd.s32 1, %v2765_v39  ;;  %p2441_p3 = pneg %p2440_p1  ;;  %s2444_s10 = scalar_lea.vmem %s2443_s22, 256 }
  0x77   : > { %2092 = vmatprep.subr.bf16.mxu1 %v2301_v13  ;;  %v412_v42 = vrot.slane %v2762_v38, 7  ;;  %v472_v47 = vrot.slane %v2771_v43, 1  ;;  %v420_v50 = vsel %vm413_vm0, %v405_v40, %v406_v41  ;;  %v342_v53 = vrot.slane %v2762_v38, 6  ;;  %v2802_v59 = vld [vmem:[%s2738_s21 + $0x18] sm:$0xff]  ;;  %v2805_v60 = vld [vmem:[%s2738_s21 + $0x20] sm:$0xff]  ;;  %vm1998_vm7 = vmpackc.low %vm2517_vm5, %vm369_vm4  ;;  %p2446_p9 = scmp.lt.s32.totalorder %s2444_s10, %s2438_s20 }
  0x78   : > { %v485_v57 = vsel %vm478_vm1, %v470_v44, %v471_v46  ;;  %v352_v58 = vsel %vm345_vm2, %v335_v48, %v336_v49  ;;  %v407_v63 = vrot.slane %v2771_v43, 7  ;;  %v408_v0 = vrot.slane %v2802_v59, 7  ;;  %v2321_v2 = vld [vmem:[#allocation5 + $0x108] sm:$0xff]   ;;  %v2322_v20 = vld [vmem:[#allocation5 + $0x110] sm:$0xff]   ;;  %v2040_v52 = vld [vmem:[%s3142_s6] ss:$0 sm:$0xff] }
  0x79   : > { %2053 = vmatpush3.bf16.msra.mxu0 %v2302_v14  ;;  %v421_v51 = vsel %vm413_vm0, %v412_v42, %v405_v40  ;;  %v484_v56 = vsel %vm478_vm1, %v471_v46, %v472_v47  ;;  %v353_v62 = vsel %vm345_vm2, %v342_v53, %v335_v48  ;;  %v473_v3 = vrot.slane %v2802_v59, 1  ;;  %v2826_v9 = vld [vmem:[%s2738_s21 + $0x28] sm:$0xff]  ;;  %v2324_v46 = vld [vmem:[#allocation5 + $0x120] sm:$0xff]   ;;  %p2447_p12 = por %p2446_p9, %p2445_p7 }
  0x7a   : > { %2093 = vmatpush3.bf16.msra.mxu1 %v2303_v15  ;;  %2054 = vmatprep.subr.bf16.mxu0 %v2304_v16  ;;  %v1996_v55 = vpack.c.bf16 %v420_v50, %v421_v51  ;;  %v527_v61 = vpack.c.bf16 %v484_v56, %v485_v57  ;;  %v1999_v1 = vpack.c.bf16 %v352_v58, %v353_v62  ;;  %v474_v4 = vrot.slane %v2805_v60, 1  ;;  %v2835_v15 = vld [vmem:[%s2738_s21 + $0x30] sm:$0xff] }
  0x7b   : > { %2094 = vmatprep.subr.bf16.mxu1 %v2305_v17  ;;  %v337_v5 = vrot.slane %v2771_v43, 6  ;;  %v418_v6 = vsel %vm413_vm0, %v407_v63, %v408_v0  ;;  %v419_v7 = vsel %vm413_vm0, %v406_v41, %v407_v63  ;;  %v338_v8 = vrot.slane %v2802_v59, 6  ;;  %v2325_v63 = vld [vmem:[#allocation5 + $0x128] sm:$0xff]   ;;  %p2448_p2 = pnand %p2447_p12, %p2441_p3 }
  0x7c   : > { %1997 = vmatprep.mubr.msk.bf16.mxu0 %vm2786_vm6, %v1996_v55  ;;  %1009 = vmatprep.mubr.bf16.mxu1 %v527_v61  ;;  %v463_v11 = vpack.c.bf16 %v418_v6, %v419_v7  ;;  %v482_v12 = vsel %vm478_vm1, %v473_v3, %v474_v4  ;;  %v483_v13 = vsel %vm478_vm1, %v472_v47, %v473_v3  ;;  %v409_v14 = vrot.slane %v2805_v60, 7 }
  0x7d   : > { %2055 = vmatpush3.bf16.msra.mxu0 %v2306_v18  ;;  %v528_v16 = vpack.c.bf16 %v482_v12, %v483_v13  ;;  %v350_v17 = vsel %vm345_vm2, %v337_v5, %v338_v8  ;;  %v351_v18 = vsel %vm345_vm2, %v336_v49, %v337_v5  ;;  %v411_v32 = vrot.slane %v2835_v15, 7  ;;  %v2327_v5 = vld [vmem:[#allocation5 + $0x138] sm:$0xff]  }
  0x7e   : > { %2095 = vmatpush3.bf16.msra.mxu1 %v2307_v19  ;;  %2056 = vmatprep.subr.bf16.mxu0 %v2308_v21  ;;  %v410_v19 = vrot.slane %v2826_v9, 7  ;;  %v417_v21 = vsel %vm413_vm0, %v408_v0, %v409_v14  ;;  %vm510_vm8 = vcmp.lt.s32.totalorder %v494_v10, 64  ;;  %v477_v40 = vrot.slane %v2762_v38, 1 }
  0x7f   : > { %2096 = vmatprep.subr.bf16.mxu1 %v2309_v22  ;;  %v475_v22 = vrot.slane %v2826_v9, 1  ;;  %v414_v47 = vsel %vm413_vm0, %v411_v32, %v412_v42  ;;  %v341_v49 = vrot.slane %v2835_v15, 6  ;;  %v531_v50 = vrot.slane %v2756_v36, 2  ;;  %vm2875_vm10 = vmpackc.low %vm510_vm8, %vm2517_vm5 }
  0x80   : > { %v415_v48 = vsel %vm413_vm0, %v410_v19, %v411_v32  ;;  %v532_v51 = vrot.slane %v2759_v37, 2  ;;  %v534_v55 = vrot.slane %v2802_v59, 2  ;;  %v535_v56 = vrot.slane %v2805_v60, 2  ;;  %v2343_v32 = vld [vmem:[#allocation7 + $0xa8] sm:$0xff]  }
  0x81   : > { %2057 = vmatpush3.bf16.msra.mxu0 %v2310_v23  ;;  %v476_v23 = vrot.slane %v2835_v15, 1  ;;  %v536_v57 = vrot.slane %v2826_v9, 2  ;;  %v537_v58 = vrot.slane %v2835_v15, 2  ;;  %v468_v62 = vpack.c.bf16 %v2826_v9, %v2805_v60 }
  0x82   : > { %2097 = vmatpush3.bf16.msra.mxu1 %v2311_v24  ;;  %2058 = vmatprep.subr.bf16.mxu0 %v2312_v26  ;;  %v467_v24 = vpack.c.bf16 %v2802_v59, %v2771_v43  ;;  %v416_v26 = vsel %vm413_vm0, %v409_v14, %v410_v19  ;;  %v465_v59 = vpack.c.bf16 %v414_v47, %v415_v48  ;;  %v538_v12 = vrot.slane %v2762_v38, 2  ;;  %v2329_v19 = vld [vmem:[#allocation7 + $0x40] sm:$0xff]   ;;  %v2351_v47 = vld [vmem:[#allocation7 + $0x38] sm:$0xff]  }
  0x83   : > { %2098 = vmatprep.subr.bf16.mxu1 %v2313_v27  ;;  %v339_v27 = vrot.slane %v2805_v60, 6  ;;  %v480_v30 = vsel %vm478_vm1, %v475_v22, %v476_v23  ;;  %v479_v37 = vsel %vm478_vm1, %v476_v23, %v477_v40  ;;  %v346_v36 = vsel %vm345_vm2, %v341_v49, %v342_v53  ;;  %v2335_v23 = vld [vmem:[#allocation7 + $0x50] sm:$0xff]  }
  0x84   : > { %v543_v6 = vsel %vm539_vm9, %v534_v55, %v535_v56  ;;  %v555_v13 = vadd.s32 2, %v2765_v39  ;;  %v540_v14 = vsel %vm539_vm9, %v537_v58, %v538_v12  ;;  %v2331_v39 = vld [vmem:[#allocation7 + $0x88] sm:$0xff]   ;;  %vm1316_vm8 = vcmask 1042434  }
  0x85   : > { %2059 = vmatpush3.bf16.msra.mxu0 %v2314_v28  ;;  %v340_v28 = vrot.slane %v2826_v9, 6  ;;  %v542_v9 = vsel %vm539_vm9, %v535_v56, %v536_v57 }
  0x86   : > { %2099 = vmatpush3.bf16.msra.mxu1 %v2315_v29  ;;  %2060 = vmatprep.subr.bf16.mxu0 %v2316_v31  ;;  %v402_v29 = vpack.c.bf16 %v350_v17, %v351_v18  ;;  %v481_v31 = vsel %vm478_vm1, %v474_v4, %v475_v22  ;;  %v469_v4 = vpack.c.bf16 %v2762_v38, %v2835_v15  ;;  %vm571_vm11 = vcmp.lt.s32.totalorder %v555_v13, 64  ;;  %v2328_v17 = vld [vmem:[#allocation7 + $0x80] sm:$0xff]   ;;  %v2334_v22 = vld [vmem:[#allocation7 + $0x90] sm:$0xff]  }
  0x87   : > { %2100 = vmatprep.subr.bf16.mxu1 %v2317_v33  ;;  %v464_v33 = vpack.c.bf16 %v416_v26, %v417_v21  ;;  %v348_v41 = vsel %vm345_vm2, %v339_v27, %v340_v28  ;;  %v547_v15 = vsel %vm539_vm9, %v538_v12, %v531_v50  ;;  %vm2004_vm12 = vmpackc.low %vm571_vm11, %vm2517_vm5  ;;  %v2518_v18 = vmov 0.0   ;;  %v2330_v38 = vld [vmem:[#allocation7] sm:$0xff]   ;;  %v2333_v21 = vld [vmem:[#allocation7 + $0x8] sm:$0xff]  }
  0x88   : > { %v2337_v26 = vld [vmem:[#allocation7 + $0x98] sm:$0xff]  }
  0x89   : > { %2061 = vmatpush3.bf16.msra.mxu0 %v2318_v34  ;;  %v2323_v34 = vld [vmem:[#allocation5 + $0x118] sm:$0xff]  }
  0x8a   : > { %2101 = vmatpush3.bf16.msra.mxu1 %v2319_v35  ;;  %2169 = vmatprep.subr.bf16.mxu0 %v2320_v45  ;;  %v529_v35 = vpack.c.bf16 %v480_v30, %v481_v31  ;;  %v2341_v30 = vld [vmem:[#allocation7 + $0x60] sm:$0xff]  }
  0x8b   : > { %2138 = vmatprep.subr.bf16.mxu1 %v2329_v19  ;;  %v2342_v31 = vld [vmem:[#allocation7 + $0x20] sm:$0xff]  }
  0x8c   : > { %2000 = vmatmul.mubr.msk.bf16.vlgmr.msra.gmra.mrb[0].mxu0 %vm1998_vm7, %v1999_v1  ;;  %v2326_v1 = vld [vmem:[#allocation5 + $0x130] sm:$0xff]   ;;  %vm1314_vm7 = vcmask 1041409  }
  0x8d   : > { %1010 = vmatmul.mubr.bf16.vlgmr.msra.gmra.mrb[0].mxu1 %v466_v54  ;;  %2170 = vmatpush3.bf16.msra.mxu0 %v2320_v45  ;;  %v349_v45 = vsel %vm345_vm2, %v338_v8, %v339_v27  ;;  %v533_v54 = vrot.slane %v2771_v43, 2  ;;  %v486_v43 = vsel %vm478_vm1, %v477_v40, %v470_v44  ;;  %v347_v44 = vsel %vm345_vm2, %v340_v28, %v341_v49  ;;  %v2338_v27 = vld [vmem:[#allocation7 + $0x58] sm:$0xff]   ;;  %v2347_v40 = vld [vmem:[#allocation7 + $0x70] sm:$0xff]  }
  0x8e   : > { %2171 = vmatprep.subr.bf16.mxu0 %v2321_v2  ;;  %952 = vmatprep.mubr.bf16.mxu0 %v463_v11  ;;  %v403_v61 = vpack.c.bf16 %v348_v41, %v349_v45  ;;  %v2002_v0 = vpack.c.bf16 %v486_v43, %v479_v37  ;;  %v404_v3 = vpack.c.bf16 %v346_v36, %v347_v44  ;;  %v2339_v28 = vld [vmem:[#allocation7 + $0x18] sm:$0xff]   ;;  %v2348_v41 = vld [vmem:[#allocation7 + $0x30] sm:$0xff]  }
  0x8f   : > { %1017 = vmatprep.mubr.bf16.mxu1 %v528_v16  ;;  %v545_v60 = vsel %vm539_vm9, %v532_v51, %v533_v54  ;;  %v544_v7 = vsel %vm539_vm9, %v533_v54, %v534_v55  ;;  %v541_v8 = vsel %vm539_vm9, %v536_v57, %v537_v58  ;;  %v2005_v16 = vpack.c.bf16 %v547_v15, %v540_v14  ;;  %v2349_v45 = vld [vmem:[#allocation7 + $0xb8] sm:$0xff]  }
  0x90   : > { %v589_v10 = vpack.c.bf16 %v543_v6, %v544_v7  ;;  %v590_v11 = vpack.c.bf16 %v541_v8, %v542_v9  ;;  %2139 = vmatpush3.bf16.msra.mxu1 %v2330_v38 }
  0x91   : > { %2172 = vmatpush3.bf16.msra.mxu0 %v2321_v2  ;;  %v546_v2 = vsel %vm539_vm9, %v531_v50, %v532_v51  ;;  %vm1318_vm9 = vcmask 1043459  }
  0x92   : > { %2173 = vmatprep.subr.bf16.mxu0 %v2322_v20  ;;  %v588_v53 = vpack.c.bf16 %v545_v60, %v546_v2 }
  0x94   : > { %953 = vmatmul.mubr.bf16.gmra.mrb[4].mxu0 %v402_v29  ;;  %v2340_v29 = vld [vmem:[#allocation7 + $0xa0] sm:$0xff]  }
  0x95   : > { %1018 = vmatmul.mubr.bf16.gmra.mrb[4].mxu1 %v467_v24  ;;  %2174 = vmatpush3.bf16.msra.mxu0 %v2322_v20  ;;  %v2332_v20 = vld [vmem:[#allocation7 + $0x48] sm:$0xff]   ;;  %v2336_v24 = vld [vmem:[#allocation7 + $0x10] sm:$0xff]  }
  0x96   : > { %960 = vmatprep.mubr.bf16.mxu0 %v464_v33  ;;  %2175 = vmatprep.subr.bf16.mxu0 %v2323_v34  ;;  %v2344_v33 = vld [vmem:[#allocation7 + $0x68] sm:$0xff]  }
  0x97   : > { %1025 = vmatprep.mubr.bf16.mxu1 %v529_v35  ;;  %2140 = vmatprep.subr.bf16.mxu1 %v2332_v20  ;;  %v2346_v35 = vld [vmem:[#allocation7 + $0xb0] sm:$0xff]  }
  0x98   : > { %2141 = vmatpush3.bf16.msra.mxu1 %v2333_v21 }
  0x99   : > { %2176 = vmatpush3.bf16.msra.mxu0 %v2323_v34  ;;  %2142 = vmatprep.subr.bf16.mxu1 %v2335_v23  ;;  %v2345_v34 = vld [vmem:[#allocation7 + $0x28] sm:$0xff]  }
  0x9a   : > { %2177 = vmatprep.subr.bf16.mxu0 %v2324_v46 }
  0x9c   : > { %961 = vmatmul.mubr.bf16.gmra.mrb[8].mxu0 %v403_v61  ;;  %2143 = vmatpush3.bf16.msra.mxu1 %v2336_v24 }
  0x9d   : > { %1026 = vmatmul.mubr.bf16.gmra.mrb[8].mxu1 %v468_v62  ;;  %2178 = vmatpush3.bf16.msra.mxu0 %v2324_v46  ;;  %v2350_v46 = vld [vmem:[#allocation7 + $0x78] sm:$0xff]  }
  0x9e   : > { %968 = vmatprep.mubr.bf16.mxu0 %v465_v59  ;;  %2179 = vmatprep.subr.bf16.mxu0 %v2325_v63 }
  0x9f   : > { %2003 = vmatprep.mubr.msk.bf16.mxu1 %vm2875_vm10, %v2002_v0  ;;  %2144 = vmatprep.subr.bf16.mxu1 %v2338_v27  ;;  %vm1320_vm10 = vcmask 1044484  }
  0xa0   : > { %2145 = vmatpush3.bf16.msra.mxu1 %v2339_v28 }
  0xa1   : > { %2180 = vmatpush3.bf16.msra.mxu0 %v2325_v63  ;;  %2146 = vmatprep.subr.bf16.mxu1 %v2341_v30 }
  0xa2   : > { %2181 = vmatprep.subr.bf16.mxu0 %v2326_v1 }
  0xa4   : > { %969 = vmatmul.mubr.bf16.gmra.mrb[12].mxu0 %v404_v3  ;;  %2147 = vmatpush3.bf16.msra.mxu1 %v2342_v31 }
  0xa5   : > { %1034 = vmatmul.mubr.bf16.gmra.mrb[12].mxu1 %v469_v4  ;;  %2182 = vmatpush3.bf16.msra.mxu0 %v2326_v1 }
  0xa6   : > { %2185 = vmatprep.mubr.bf16.mxu0 %v588_v53  ;;  %2183 = vmatprep.subr.bf16.mxu0 %v2327_v5 }
  0xa7   : > { %2148 = vmatprep.subr.bf16.mxu1 %v2344_v33 }
  0xa8   : > { %2149 = vmatpush3.bf16.msra.mxu1 %v2345_v34 }
  0xa9   : > { %2184 = vmatpush3.bf16.msra.mxu0 %v2327_v5  ;;  %2150 = vmatprep.subr.bf16.mxu1 %v2347_v40  ;;  %v2929_v40 = vld [vmem:[%s3138_s2] ss:$0 sm:$0xff] }
  0xaa   : > { %2193 = vmatprep.subr.bf16.mxu0 %v2518_v18 }
  0xac   : > { %2186 = vmatmul.mubr.bf16.vlgmr.msra.gmra.mrb[16].mxu0 %v589_v10  ;;  %2151 = vmatpush3.bf16.msra.mxu1 %v2348_v41 }
  0xad   : > { %2189 = vmatprep.mubr.bf16.mxu0 %v590_v11  ;;  %2194 = vmatpush3.bf16.msra.mxu0 %v2328_v17 }
  0xae   : > { %2195 = vmatprep.subr.bf16.mxu0 %v2518_v18  ;;  %2152 = vmatprep.subr.bf16.mxu1 %v2350_v46  ;;  %v2934_v46 = vld [vmem:[%s3139_s3] ss:$0 sm:$0xff] }
  0xb0   : > { %2153 = vmatpush3.bf16.msra.mxu1 %v2351_v47 }
  0xb1   : > { %2196 = vmatpush3.bf16.msra.mxu0 %v2331_v39 }
  0xb2   : > { %2197 = vmatprep.subr.bf16.mxu0 %v2518_v18 }
  0xb4   : > { %2190 = vmatmul.mubr.msk.bf16.gmra.mrb[20].mxu0 %vm2004_vm12, %v2005_v16  ;;  %vm1322_vm12 = vcmask 1045509  }
  0xb5   : > { %2198 = vmatpush3.bf16.msra.mxu0 %v2334_v22  ;;  %2209 = vmatprep.mubr.msk.bf16.mxu0 %vm2519_vm13, %v2518_v18  ;;  %vm1324_vm13 = vcmask 1046534  }
  0xb6   : > { %2199 = vmatprep.subr.bf16.mxu0 %v2518_v18 }
  0xb9   : > { %2200 = vmatpush3.bf16.msra.mxu0 %v2337_v26 }
  0xba   : > { %2201 = vmatprep.subr.bf16.mxu0 %v2518_v18 }
  0xbd   : > { %2202 = vmatpush3.bf16.msra.mxu0 %v2340_v29 }
  0xbe   : > { %2203 = vmatprep.subr.bf16.mxu0 %v2518_v18 }
  0xc1   : > { %2204 = vmatpush3.bf16.msra.mxu0 %v2343_v32 }
  0xc2   : > { %2205 = vmatprep.subr.bf16.mxu0 %v2518_v18 }
  0xc5   : > { %2206 = vmatpush3.bf16.msra.mxu0 %v2346_v35 }
  0xc6   : > { %2207 = vmatprep.subr.bf16.mxu0 %v2518_v18 }
  0xc9   : > { %2208 = vmatpush3.bf16.msra.mxu0 %v2349_v45 }
 0x15f   : > { %v2062_v48 = vpop.f32.mrb[0].mxu0 }
 0x160   : > { %v2102_v49 = vpop.f32.mrb[0].mxu1  ;;  %v2063_v50 = vpop.f32.mrb[1].mxu0 }
 0x161   : > { %v2103_v51 = vpop.f32.mrb[1].mxu1  ;;  %v2064_v54 = vadd.f32 %v2063_v50, %v2062_v48  ;;  %v2065_v55 = vpop.f32.mrb[2].mxu0 }
 0x162   : > { %v2104_v42 = vadd.f32 %v2103_v51, %v2102_v49  ;;  %v2105_v56 = vpop.f32.mrb[2].mxu1  ;;  %v2066_v57 = vpop.f32.mrb[3].mxu0 }
 0x163   : > { %v2106_v58 = vpop.f32.mrb[3].mxu1  ;;  %v2067_v37 = vadd.f32 %v2066_v57, %v2065_v55 }
 0x164   : > { %v2107_v43 = vadd.f32 %v2106_v58, %v2105_v56  ;;  %v1012_v61 = vadd.f32 %v2104_v42, %v2064_v54 }
 0x166   : > { %v1015_v62 = vadd.f32 %v2107_v43, %v2067_v37 }
 0x167   : > { %v2068_v63 = vpop.f32.mrb[4].mxu0 }
 0x168   : > { %v2108_v59 = vpop.f32.mrb[4].mxu1  ;;  %v2069_v0 = vpop.f32.mrb[5].mxu0 }
 0x169   : > { %v2109_v1 = vpop.f32.mrb[5].mxu1  ;;  %v2070_v36 = vadd.f32 %v2069_v0, %v2068_v63  ;;  %v2071_v60 = vpop.f32.mrb[6].mxu0 }
 0x16a   : > { %v2110_v44 = vadd.f32 %v2109_v1, %v2108_v59  ;;  %v2111_v2 = vpop.f32.mrb[6].mxu1  ;;  %v2072_v3 = vpop.f32.mrb[7].mxu0 }
 0x16b   : > { %v2112_v4 = vpop.f32.mrb[7].mxu1  ;;  %v2073_v5 = vadd.f32 %v2072_v3, %v2071_v60 }
 0x16c   : > { %v2113_v53 = vadd.f32 %v2112_v4, %v2111_v2  ;;  %v1020_v6 = vadd.f32 %v2110_v44, %v2070_v36 }
 0x16e   : > { %v1023_v7 = vadd.f32 %v2113_v53, %v2073_v5 }
 0x16f   : > { %v2074_v8 = vpop.f32.mrb[8].mxu0 }
 0x170   : > { %v2114_v9 = vpop.f32.mrb[8].mxu1  ;;  %v2075_v10 = vpop.f32.mrb[9].mxu0 }
 0x171   : > { %v2115_v11 = vpop.f32.mrb[9].mxu1  ;;  %v2076_v12 = vadd.f32 %v2075_v10, %v2074_v8  ;;  %v2077_v14 = vpop.f32.mrb[10].mxu0 }
 0x172   : > { %v2116_v13 = vadd.f32 %v2115_v11, %v2114_v9  ;;  %v2117_v15 = vpop.f32.mrb[10].mxu1  ;;  %v2078_v16 = vpop.f32.mrb[11].mxu0 }
 0x173   : > { %v2118_v17 = vpop.f32.mrb[11].mxu1  ;;  %v2079_v18 = vadd.f32 %v2078_v16, %v2077_v14 }
 0x174   : > { %v2119_v19 = vadd.f32 %v2118_v17, %v2117_v15  ;;  %v2920_v38 = vadd.f32 %v2116_v13, %v2076_v12 }
 0x176   : > { %v2922_v39 = vadd.f32 %v2119_v19, %v2079_v18 }
 0x177   : > { %v2080_v20 = vpop.f32.mrb[12].mxu0 }
 0x178   : > { %v2120_v21 = vpop.f32.mrb[12].mxu1  ;;  %v2081_v22 = vpop.f32.mrb[13].mxu0 }
 0x179   : > { %v2121_v23 = vpop.f32.mrb[13].mxu1  ;;  %v2082_v24 = vadd.f32 %v2081_v22, %v2080_v20  ;;  %v2083_v27 = vpop.f32.mrb[14].mxu0 }
 0x17a   : > { %v2122_v26 = vadd.f32 %v2121_v23, %v2120_v21  ;;  %v2123_v28 = vpop.f32.mrb[14].mxu1  ;;  %v2084_v29 = vpop.f32.mrb[15].mxu0 }
 0x17b   : > { %v2124_v30 = vpop.f32.mrb[15].mxu1  ;;  %v2085_v31 = vadd.f32 %v2084_v29, %v2083_v27 }
 0x17c   : > { %v2125_v32 = vadd.f32 %v2124_v30, %v2123_v28  ;;  %v1036_v33 = vadd.f32 %v2122_v26, %v2082_v24 }
 0x17e   : > { %v2924_v34 = vadd.f32 %v2125_v32, %v2085_v31 }
 0x17f   : > { %v2187_v35 = vpop.f32.mrb[16].mxu0 }
 0x180   : > { %v1085_v41 = vadd.f32 %v2187_v35, %v1020_v6  ;;  %v1076_v45 = vpop.f32.mrb[17].mxu0 }
 0x181   : > { %v1077_v47 = vadd.f32 %v1076_v45, %v1012_v61  ;;  %v2188_v48 = vpop.f32.mrb[18].mxu0 }
 0x182   : > { %v1116_v49 = vmul.f32 %v2929_v40, %v1085_v41  ;;  %v1088_v50 = vadd.f32 %v2188_v48, %v1023_v7  ;;  %v1079_v51 = vpop.f32.mrb[19].mxu0 }
 0x183   : > { %v1114_v54 = vmul.f32 %v2929_v40, %v1077_v47  ;;  %v1080_v42 = vadd.f32 %v1079_v51, %v1015_v62 }
 0x184   : > { %v1131_v55 = vadd.f32 %v2934_v46, %v1116_v49  ;;  %v1117_v56 = vmul.f32 %v2929_v40, %v1088_v50 }
 0x185   : > { %v1129_v57 = vadd.f32 %v2934_v46, %v1114_v54  ;;  %v1115_v58 = vmul.f32 %v2929_v40, %v1080_v42 }
 0x186   : > { %vm1139_vm14 = vcmp.ge.f32.partialorder %v1131_v55, 0.0  ;;  %v1147_v37 = vmul.f32 0.01, %v1131_v55  ;;  %v1132_v43 = vadd.f32 %v2934_v46, %v1117_v56 }
 0x187   : > { %vm1137_vm2 = vcmp.ge.f32.partialorder %v1129_v57, 0.0  ;;  %v1145_v61 = vmul.f32 0.01, %v1129_v57  ;;  %v1130_v63 = vadd.f32 %v2934_v46, %v1115_v58  ;;  %v2191_v59 = vpop.f32.mrb[20].mxu0 }
 0x188   : > { %v1155_v0 = vsel %vm1139_vm14, %v1131_v55, %v1147_v37  ;;  %vm1140_vm3 = vcmp.ge.f32.partialorder %v1132_v43, 0.0  ;;  %v1148_v62 = vmul.f32 0.01, %v1132_v43  ;;  %v1101_v1 = vadd.f32 %v2191_v59, %v1036_v33  ;;  %v1092_v36 = vpop.f32.mrb[21].mxu0 }
 0x189   : > { %v1171_v44 = vcombine.high %v1155_v0, %v1155_v0  ;;  %v1214_v60 = vsel %vm1185_vm15, %v1155_v0, -inf  ;;  %v1153_v2 = vsel %vm1137_vm2, %v1129_v57, %v1145_v61  ;;  %vm1138_vm4 = vcmp.ge.f32.partialorder %v1130_v63, 0.0  ;;  %v2945_v3 = vpop.f32.mrb[22].mxu0 }
 0x18a   : > { %v1215_v4 = vrot.slane %v1214_v60, 4  ;;  %v1169_v5 = vcombine.high %v1153_v2, %v1153_v2  ;;  %v1186_v53 = vsel %vm1185_vm15, %v1153_v2, -inf  ;;  %v1156_v6 = vsel %vm1140_vm3, %v1132_v43, %v1148_v62  ;;  %v2948_v7 = vpop.f32.mrb[23].mxu0 }
 0x18b   : > { %v1221_v8 = vsel %vm1185_vm15, %v1171_v44, -inf  ;;  %v1187_v9 = vrot.slane %v1186_v53, 4  ;;  %v1172_v10 = vcombine.high %v1156_v6, %v1156_v6  ;;  %v1228_v11 = vsel %vm1185_vm15, %v1156_v6, -inf }
 0x18c   : > { %v1216_v12 = vmax.f32 %v1214_v60, %v1215_v4  ;;  %v1222_v13 = vrot.slane %v1221_v8, 4  ;;  %v1193_v14 = vsel %vm1185_vm15, %v1169_v5, -inf  ;;  %v1229_v15 = vrot.slane %v1228_v11, 4 }
 0x18d   : > { %v1188_v16 = vmax.f32 %v1186_v53, %v1187_v9  ;;  %v1194_v17 = vrot.slane %v1193_v14, 4  ;;  %v1235_v18 = vsel %vm1185_vm15, %v1172_v10, -inf  ;;  %v1146_v19 = vmul.f32 0.01, %v1130_v63 }
 0x18e   : > { %v1236_v20 = vrot.slane %v1235_v18, 4  ;;  %v1217_v21 = vrot.slane %v1216_v12, 2  ;;  %v1223_v26 = vmax.f32 %v1221_v8, %v1222_v13  ;;  %v1230_v27 = vmax.f32 %v1228_v11, %v1229_v15 }
 0x18f   : > { %v1189_v22 = vrot.slane %v1188_v16, 2  ;;  %v1195_v23 = vmax.f32 %v1193_v14, %v1194_v17  ;;  %v1154_v24 = vsel %vm1138_vm4, %v1130_v63, %v1146_v19  ;;  %v1120_v33 = vmul.f32 %v2929_v40, %v1101_v1 }
 0x190   : > { %v1237_v28 = vmax.f32 %v1235_v18, %v1236_v20  ;;  %v1170_v31 = vcombine.high %v1154_v24, %v1154_v24  ;;  %v1200_v32 = vsel %vm1185_vm15, %v1154_v24, -inf  ;;  %v1218_v35 = vmax.f32 %v1216_v12, %v1217_v21 }
 0x191   : > { %v1190_v29 = vmax.f32 %v1188_v16, %v1189_v22  ;;  %v1196_v30 = vrot.slane %v1195_v23, 2  ;;  %v1201_v45 = vrot.slane %v1200_v32, 4  ;;  %v1224_v48 = vrot.slane %v1223_v26, 2 }
 0x192   : > { %v1207_v47 = vsel %vm1185_vm15, %v1170_v31, -inf  ;;  %v1231_v49 = vrot.slane %v1230_v27, 2  ;;  %v1238_v50 = vrot.slane %v1237_v28, 2  ;;  %v1135_v56 = vadd.f32 %v2934_v46, %v1120_v33 }
 0x193   : > { %v1197_v41 = vmax.f32 %v1195_v23, %v1196_v30  ;;  %v1191_v51 = vrot.slane %v1190_v29, 1  ;;  %v1202_v42 = vmax.f32 %v1200_v32, %v1201_v45  ;;  %v1208_v55 = vrot.slane %v1207_v47, 4 }
 0x194   : > { %v1219_v57 = vrot.slane %v1218_v35, 1  ;;  %v1225_v61 = vmax.f32 %v1223_v26, %v1224_v48  ;;  %vm1143_vm11 = vcmp.ge.f32.partialorder %v1135_v56, 0.0  ;;  %v1151_v63 = vmul.f32 0.01, %v1135_v56 }
 0x195   : > { %v1198_v54 = vrot.slane %v1197_v41, 1  ;;  %v1203_v37 = vrot.slane %v1202_v42, 2  ;;  %v1209_v43 = vmax.f32 %v1207_v47, %v1208_v55  ;;  %v1093_v59 = vadd.f32 %v1092_v36, %v2920_v38 }
 0x196   : > { %v2962_v0 = vmax.f32 %v1190_v29, %v1191_v51  ;;  %v1232_v62 = vmax.f32 %v1230_v27, %v1231_v49  ;;  %v1239_v1 = vmax.f32 %v1237_v28, %v1238_v50  ;;  %v1159_v2 = vsel %vm1143_vm11, %v1135_v56, %v1151_v63 }
 0x197   : > { %v2959_v58 = vmax.f32 %v1197_v41, %v1198_v54  ;;  %v1204_v44 = vmax.f32 %v1202_v42, %v1203_v37  ;;  %v1210_v60 = vrot.slane %v1209_v43, 2  ;;  %v1118_v4 = vmul.f32 %v2929_v40, %v1093_v59 }
 0x198   : > { %v1104_v5 = vadd.f32 %v2945_v3, %v2924_v34  ;;  %v1175_v8 = vcombine.high %v1159_v2, %v1159_v2  ;;  %v1270_v38 = vsel %vm1185_vm15, %v1159_v2, -inf  ;;  %v1226_v12 = vrot.slane %v1225_v61, 1 }
 0x199   : > { %v1315_v53 = vsel %vm1314_vm7, %v2959_v58, %v2962_v0  ;;  %v1205_v6 = vrot.slane %v1204_v44, 1  ;;  %v1211_v36 = vmax.f32 %v1209_v43, %v1210_v60  ;;  %v1271_v9 = vrot.slane %v1270_v38, 4 }
 0x19a   : > { %v1133_v10 = vadd.f32 %v2934_v46, %v1118_v4  ;;  %v1121_v11 = vmul.f32 %v2929_v40, %v1104_v5  ;;  %v1277_v34 = vsel %vm1185_vm15, %v1175_v8, -inf  ;;  %v1096_v3 = vadd.f32 %v2948_v7, %v2922_v39 }
 0x19b   : > { %v2973_v13 = vmax.f32 %v1204_v44, %v1205_v6  ;;  %v1212_v14 = vrot.slane %v1211_v36, 1  ;;  %v1272_v15 = vmax.f32 %v1270_v38, %v1271_v9  ;;  %v1278_v16 = vrot.slane %v1277_v34, 4 }
 0x19c   : > { %vm1141_vm14 = vcmp.ge.f32.partialorder %v1133_v10, 0.0  ;;  %vm1326_vm2 = vcmask 1047559   ;;  %v2978_v17 = vmax.f32 %v1218_v35, %v1219_v57  ;;  %v1149_v19 = vmul.f32 0.01, %v1133_v10 }
 0x19d   : > { %v1317_v18 = vsel %vm1316_vm8, %v2973_v13, %v1315_v53  ;;  %v1136_v20 = vadd.f32 %v2934_v46, %v1121_v11  ;;  %v1233_v21 = vrot.slane %v1232_v62, 1  ;;  %v1240_v22 = vrot.slane %v1239_v1, 1 }
 0x19e   : > { %v2983_v23 = vmax.f32 %v1211_v36, %v1212_v14  ;;  %v1119_v24 = vmul.f32 %v2929_v40, %v1096_v3  ;;  %v1279_v39 = vmax.f32 %v1277_v34, %v1278_v16  ;;  %v1157_v7 = vsel %vm1141_vm14, %v1133_v10, %v1149_v19 }
 0x19f   : > { %vm1144_vm3 = vcmp.ge.f32.partialorder %v1136_v20, 0.0  ;;  %v1152_v26 = vmul.f32 0.01, %v1136_v20  ;;  %v2986_v27 = vmax.f32 %v1225_v61, %v1226_v12  ;;  %v1273_v29 = vrot.slane %v1272_v15, 2 }
 0x1a0   : > { %v1319_v28 = vsel %vm1318_vm9, %v2983_v23, %v1317_v18  ;;  %v1173_v30 = vcombine.high %v1157_v7, %v1157_v7  ;;  %v1242_v32 = vsel %vm1185_vm15, %v1157_v7, -inf  ;;  %v1134_v35 = vadd.f32 %v2934_v46, %v1119_v24 }
 0x1a1   : > { %v1321_v31 = vsel %vm1320_vm10, %v2978_v17, %v1319_v28  ;;  %v1160_v33 = vsel %vm1144_vm3, %v1136_v20, %v1152_v26  ;;  %v2994_v40 = vmax.f32 %v1232_v62, %v1233_v21  ;;  %v2996_v41 = vmax.f32 %v1239_v1, %v1240_v22 }
 0x1a2   : > { %v1323_v45 = vsel %vm1322_vm12, %v2986_v27, %v1321_v31  ;;  %v1243_v47 = vrot.slane %v1242_v32, 4  ;;  %v1280_v48 = vrot.slane %v1279_v39, 2  ;;  %v1249_v49 = vsel %vm1185_vm15, %v1173_v30, -inf }
 0x1a3   : > { %v1176_v50 = vcombine.high %v1160_v33, %v1160_v33  ;;  %v1284_v51 = vsel %vm1185_vm15, %v1160_v33, -inf  ;;  %v1274_v54 = vmax.f32 %v1272_v15, %v1273_v29  ;;  %v1250_v55 = vrot.slane %v1249_v49, 4 }
 0x1a4   : > { %v1244_v42 = vmax.f32 %v1242_v32, %v1243_v47  ;;  %vm1142_vm4 = vcmp.ge.f32.partialorder %v1134_v35, 0.0  ;;  %v1285_v56 = vrot.slane %v1284_v51, 4  ;;  %v1150_v57 = vmul.f32 0.01, %v1134_v35 }
 0x1a5   : > { %v1291_v46 = vsel %vm1185_vm15, %v1176_v50, -inf  ;;  %v1325_v37 = vsel %vm1324_vm13, %v2994_v40, %v1323_v45  ;;  %v1251_v61 = vmax.f32 %v1249_v49, %v1250_v55  ;;  %v354_v59 = vadd.s32 8, %v2748_v25 }
 0x1a6   : > { %v1245_v43 = vrot.slane %v1244_v42, 2  ;;  %v1292_v63 = vrot.slane %v1291_v46, 4  ;;  %v1281_v62 = vmax.f32 %v1279_v39, %v1280_v48  ;;  %v1286_v1 = vmax.f32 %v1284_v51, %v1285_v56 }
 0x1a7   : > { %v1158_v44 = vsel %vm1142_vm4, %v1134_v35, %v1150_v57  ;;  %v3008_v60 = vsel %vm1326_vm2, %v2996_v41, %v1325_v37  ;;  %v1252_v4 = vrot.slane %v1251_v61, 2  ;;  %v1348_v6 = vpack.c.bf16 %v2962_v0, %v2962_v0 }
 0x1a8   : > { %v1246_v2 = vmax.f32 %v1244_v42, %v1245_v43  ;;  %v1293_v5 = vmax.f32 %v1291_v46, %v1292_v63  ;;  %v1174_v53 = vcombine.high %v1158_v44, %v1158_v44  ;;  %v1275_v8 = vrot.slane %v1274_v54, 1 }
 0x1a9   : > { %v1287_v38 = vrot.slane %v1286_v1, 2  ;;  %v1256_v36 = vsel %vm1185_vm15, %v1158_v44, -inf  ;;  %v1253_v10 = vmax.f32 %v1251_v61, %v1252_v4  ;;  %v1349_v34 = vpack.c.bf16 %v2959_v58, %v2959_v58 }
 0x1aa   : > { %v1247_v9 = vrot.slane %v1246_v2, 1  ;;  %v1294_v11 = vrot.slane %v1293_v5, 2  ;;  %v1257_v12 = vrot.slane %v1256_v36, 4  ;;  %v1282_v3 = vrot.slane %v1281_v62, 1 }
 0x1ab   : > { %v1288_v14 = vmax.f32 %v1286_v1, %v1287_v38  ;;  %v1263_v15 = vsel %vm1185_vm15, %v1174_v53, -inf  ;;  %v1350_v16 = vpack.c.bf16 %v2973_v13, %v2973_v13  ;;  %v1254_v18 = vrot.slane %v1253_v10, 1 }
 0x1ac   : > { %v1258_v0 = vmax.f32 %v1256_v36, %v1257_v12  ;;  %v3018_v19 = vadd.s32 1, %v354_v59  ;;  %v1391_v20 = vunpack.c.l.b16 %v1348_v6  ;;  %v1276_v21 = vmax.f32 %v1274_v54, %v1275_v8 }
 0x1ad   : > { %v1248_v22 = vmax.f32 %v1246_v2, %v1247_v9  ;;  %v1264_v24 = vrot.slane %v1263_v15, 4  ;;  %v1255_v39 = vmax.f32 %v1253_v10, %v1254_v18  ;;  %v1295_v7 = vmax.f32 %v1293_v5, %v1294_v11 }
 0x1ae   : > { %v1259_v26 = vrot.slane %v1258_v0, 2  ;;  %v1351_v58 = vpack.c.bf16 %v2983_v23, %v2983_v23  ;;  %v1392_v28 = vunpack.c.l.b16 %v1349_v34  ;;  %v1283_v29 = vmax.f32 %v1281_v62, %v1282_v3 }
 0x1af   : > { %v1289_v30 = vrot.slane %v1288_v14, 1  ;;  %v1265_v31 = vmax.f32 %v1263_v15, %v1264_v24  ;;  %v1393_v32 = vunpack.c.l.b16 %v1350_v16  ;;  %v1357_v13 = vpack.c.bf16 %v1255_v39, %v1255_v39 }
 0x1b0   : > { %v1352_v33 = vpack.c.bf16 %v2978_v17, %v2978_v17  ;;  %v1353_v35 = vpack.c.bf16 %v2986_v27, %v2986_v27  ;;  %v1356_v45 = vpack.c.bf16 %v1248_v22, %v1248_v22  ;;  %v1260_v47 = vmax.f32 %v1258_v0, %v1259_v26 }
 0x1b1   : > { %v1266_v48 = vrot.slane %v1265_v31, 2  ;;  %v1354_v49 = vpack.c.bf16 %v2994_v40, %v2994_v40  ;;  %v1296_v50 = vrot.slane %v1295_v7, 1  ;;  %v1355_v23 = vpack.c.bf16 %v2996_v41, %v2996_v41 }
 0x1b2   : > { %v1360_v51 = vpack.c.bf16 %v1276_v21, %v1276_v21  ;;  %v1394_v54 = vunpack.c.l.b16 %v1351_v58  ;;  %v1290_v42 = vmax.f32 %v1288_v14, %v1289_v30  ;;  %v1261_v55 = vrot.slane %v1260_v47, 1 }
 0x1b3   : > { %v1267_v56 = vmax.f32 %v1265_v31, %v1266_v48  ;;  %v1361_v46 = vpack.c.bf16 %v1283_v29, %v1283_v29  ;;  %v1328_v17 = vsel %vm1314_vm7, %v1255_v39, %v1248_v22  ;;  %v1400_v57 = vunpack.c.l.b16 %v1357_v13 }
 0x1b4   : > { %v1395_v27 = vunpack.c.l.b16 %v1352_v33  ;;  %v1407_v37 = vsel %vm1314_vm7, %v1392_v28, %v1391_v20  ;;  %v1399_v43 = vunpack.c.l.b16 %v1356_v45  ;;  %v1262_v61 = vmax.f32 %v1260_v47, %v1261_v55 }
 0x1b5   : > { %v1268_v63 = vrot.slane %v1267_v56, 1  ;;  %v1408_v40 = vsel %vm1316_vm8, %v1393_v32, %v1407_v37  ;;  %v1297_v59 = vmax.f32 %v1295_v7, %v1296_v50  ;;  %v1396_v62 = vunpack.c.l.b16 %v1353_v35 }
 0x1b6   : > { %v1397_v41 = vunpack.c.l.b16 %v1354_v49  ;;  %v1409_v1 = vsel %vm1318_vm9, %v1394_v54, %v1408_v40  ;;  %v1329_v2 = vsel %vm1316_vm8, %v1262_v61, %v1328_v17  ;;  %v1358_v4 = vpack.c.bf16 %v1262_v61, %v1262_v61  ;;  %v2039_v17 = vld [vmem:[%s3141_s5] ss:$0 sm:$0xff] }
 0x1b7   : > { %v1269_v44 = vmax.f32 %v1267_v56, %v1268_v63  ;;  %v1410_v5 = vsel %vm1320_vm10, %v1395_v27, %v1409_v1  ;;  %v1362_v53 = vpack.c.bf16 %v1290_v42, %v1290_v42  ;;  %v1398_v6 = vunpack.c.l.b16 %v1355_v23 }
 0x1b8   : > { %v1411_v8 = vsel %vm1322_vm12, %v1396_v62, %v1410_v5  ;;  %v1414_v38 = vsel %vm1314_vm7, %v1400_v57, %v1399_v43  ;;  %v1401_v9 = vunpack.c.l.b16 %v1358_v4  ;;  %v1363_v14 = vpack.c.bf16 %v1297_v59, %v1297_v59 }
 0x1b9   : > { %v1330_v36 = vsel %vm1318_vm9, %v1269_v44, %v1329_v2  ;;  %v1359_v10 = vpack.c.bf16 %v1269_v44, %v1269_v44  ;;  %v1412_v11 = vsel %vm1324_vm13, %v1397_v41, %v1411_v8  ;;  %v1364_v0 = vrot.slane %v3008_v60, 1 }
 0x1ba   : > { %v1331_v12 = vsel %vm1320_vm10, %v1276_v21, %v1330_v36  ;;  %v1413_v34 = vsel %vm1326_vm2, %v1398_v6, %v1412_v11  ;;  %v1415_v16 = vsel %vm1316_vm8, %v1401_v9, %v1414_v38  ;;  %vm1369_vm15 = vcmp.lt.s32.totalorder %v3018_v19, 16 }
 0x1bb   : > { %v1332_v3 = vsel %vm1322_vm12, %v1283_v29, %v1331_v12  ;;  %v1402_v15 = vunpack.c.l.b16 %v1359_v10  ;;  %v1403_v20 = vunpack.c.l.b16 %v1360_v51  ;;  %v1404_v24 = vunpack.c.l.b16 %v1361_v46  ;;  %vm2036_vm11 = vmpackc.low %vm1369_vm15, %vm2517_vm5 }
 0x1bc   : > { %v1333_v18 = vsel %vm1324_vm13, %v1290_v42, %v1332_v3  ;;  %v1405_v39 = vunpack.c.l.b16 %v1362_v53  ;;  %v1337_v58 = vrot.slane %v3008_v60, 7  ;;  %v1406_v29 = vunpack.c.l.b16 %v1363_v14 }
 0x1bd   : > { %v1334_v22 = vsel %vm1326_vm2, %v1297_v59, %v1333_v18  ;;  %v1416_v21 = vsel %vm1318_vm9, %v1402_v15, %v1415_v16  ;;  %v2520_v54 = vmov 1983009808  }
 0x1be   : > { %v1365_v7 = vrot.slane %v1334_v22, 1  ;;  %v1417_v26 = vsel %vm1320_vm10, %v1403_v20, %v1416_v21  ;;  %v1338_v28 = vrot.slane %v1334_v22, 7  ;;  %v1725_v42 = vunpack.c.l.s4 %v2520_v54 }
 0x1bf   : > { %v1418_v30 = vsel %vm1322_vm12, %v1404_v24, %v1417_v26 }
 0x1c0   : > { %v1366_v31 = vsel %vm478_vm1, %v1364_v0, %v1365_v7  ;;  %v1367_v19 = vsel %vm478_vm1, %v1365_v7, %v1364_v0  ;;  %v1419_v32 = vsel %vm1324_vm13, %v1405_v39, %v1418_v30  ;;  %v1339_v13 = vsel %vm413_vm0, %v1337_v58, %v1338_v28 }
 0x1c1   : > { %v2037_v33 = vpack.c.bf16 %v1367_v19, %v1366_v31  ;;  %v1420_v60 = vsel %vm1326_vm2, %v1406_v29, %v1419_v32  ;;  %v1340_v35 = vsel %vm413_vm0, %v1338_v28, %v1337_v58  ;;  %v1726_v43 = vunpack.c.0.s8 %v1725_v42 }
 0x1c2   : > { %v1421_v45 = vpack.c.b16 %v1420_v60, %v1413_v34  ;;  %v2034_v47 = vpack.c.bf16 %v1339_v13, %v1340_v35  ;;  %vm1765_vm1 = vcmask 1041408  }
 0x1c3   : > { %2210 = vmatmul.mubr.msk.bf16.vlgmr.msra.gmra.mrb[24].mxu0 %vm2036_vm11, %v2037_v33  ;;  %v1729_v62 = vsub.s32 %v1726_v43, %v2748_v25 }
 0x1c4   : > { %1647 = vmatprep.mubr.bf16.mxu1 %v1421_v45 }
 0x1c5   : > { %2035 = vmatmul.mubr.msk.bf16.vlgmr.msra.gmra.mrb[16].mxu1 %vm2786_vm6, %v2034_v47 }
 0x296   : > { %v1690_v48 = vpop.f32.mrb[24].mxu0 }
 0x297   : > { %v2211_v49 = vpop.f32.mrb[25].mxu0 }
 0x298   : > { %v2154_v50 = vpop.f32.mrb[16].mxu1  ;;  %v1693_v23 = vpop.f32.mrb[26].mxu0 }
 0x299   : > { %v2155_v51 = vpop.f32.mrb[17].mxu1  ;;  %v2212_v55 = vpop.f32.mrb[27].mxu0 }
 0x29a   : > { %v2156_v56 = vadd.f32 %v2155_v51, %v2154_v50  ;;  %v2157_v46 = vpop.f32.mrb[18].mxu1 }
 0x29b   : > { %v2158_v57 = vpop.f32.mrb[19].mxu1 }
 0x29c   : > { %v1691_v27 = vadd.f32 %v2156_v56, %v1690_v48  ;;  %v2159_v37 = vadd.f32 %v2158_v57, %v2157_v46 }
 0x29e   : > { %v1704_v61 = vmul.f32 %v2039_v17, %v1691_v27  ;;  %v1694_v63 = vadd.f32 %v2159_v37, %v1693_v23 }
 0x2a0   : > { %v1713_v40 = vadd.f32 %v2040_v52, %v1704_v61  ;;  %v1705_v59 = vmul.f32 %v2039_v17, %v1694_v63 }
 0x2a2   : > { %vm1715_vm0 = vcmp.ge.f32.partialorder %v1713_v40, 0.0  ;;  %v1717_v41 = vmul.f32 0.01, %v1713_v40  ;;  %v1714_v1 = vadd.f32 %v2040_v52, %v1705_v59 }
 0x2a4   : > { %v1719_v44 = vsel %vm1715_vm0, %v1713_v40, %v1717_v41  ;;  %vm1716_vm5 = vcmp.ge.f32.partialorder %v1714_v1, 0.0  ;;  %v1718_v2 = vmul.f32 0.01, %v1714_v1 }
 0x2a5   : > { %v1723_v4 = vcombine.high %v1719_v44, %v1719_v44  ;;  %v1730_v5 = vrot.slane %v1719_v44, %v1729_v62 }
 0x2a6   : > { %v1720_v53 = vsel %vm1716_vm5, %v1714_v1, %v1718_v2 }
 0x2a7   : > { %v1737_v6 = vrot.slane %v1723_v4, %v1729_v62  ;;  %v1738_v8 = vcombine.high %v1730_v5, %v1730_v5  ;;  %v1766_v38 = vsel %vm1765_vm1, %v1730_v5, -inf  ;;  %v1740_v36 = vcombine.high %v1720_v53, %v1720_v53 }
 0x2a8   : > { %v1767_v9 = vrot.slane %v1766_v38, 4  ;;  %v1747_v10 = vrot.slane %v1720_v53, %v1729_v62 }
 0x2a9   : > { %v1739_v11 = vcombine.high %v1737_v6, %v1737_v6  ;;  %v1773_v25 = vsel %vm1765_vm1, %v1738_v8, -inf  ;;  %v1780_v12 = vsel %vm1765_vm1, %v1737_v6, -inf  ;;  %v1754_v34 = vrot.slane %v1740_v36, %v1729_v62 }
 0x2aa   : > { %v1768_v3 = vmax.f32 %v1766_v38, %v1767_v9  ;;  %v1774_v14 = vrot.slane %v1773_v25, 4  ;;  %v1781_v15 = vrot.slane %v1780_v12, 4  ;;  %v1755_v16 = vcombine.high %v1747_v10, %v1747_v10 }
 0x2ab   : > { %v1787_v18 = vsel %vm1765_vm1, %v1739_v11, -inf  ;;  %v1756_v0 = vcombine.high %v1754_v34, %v1754_v34  ;;  %v1794_v20 = vsel %vm1765_vm1, %v1747_v10, -inf  ;;  %v1808_v22 = vsel %vm1765_vm1, %v1754_v34, -inf }
 0x2ac   : > { %v1769_v24 = vrot.slane %v1768_v3, 2  ;;  %v1775_v39 = vmax.f32 %v1773_v25, %v1774_v14  ;;  %v1782_v21 = vmax.f32 %v1780_v12, %v1781_v15  ;;  %v1788_v7 = vrot.slane %v1787_v18, 4 }
 0x2ad   : > { %v1795_v26 = vrot.slane %v1794_v20, 4  ;;  %v1801_v58 = vsel %vm1765_vm1, %v1755_v16, -inf  ;;  %v1809_v28 = vrot.slane %v1808_v22, 4  ;;  %v1815_v29 = vsel %vm1765_vm1, %v1756_v0, -inf }
 0x2ae   : > { %v1770_v30 = vmax.f32 %v1768_v3, %v1769_v24  ;;  %v1776_v31 = vrot.slane %v1775_v39, 2  ;;  %v1783_v19 = vrot.slane %v1782_v21, 2  ;;  %v1789_v32 = vmax.f32 %v1787_v18, %v1788_v7 }
 0x2af   : > { %v1796_v13 = vmax.f32 %v1794_v20, %v1795_v26  ;;  %v1802_v33 = vrot.slane %v1801_v58, 4  ;;  %v1810_v60 = vmax.f32 %v1808_v22, %v1809_v28  ;;  %v1816_v35 = vrot.slane %v1815_v29, 4 }
 0x2b0   : > { %v1771_v45 = vrot.slane %v1770_v30, 1  ;;  %v1777_v47 = vmax.f32 %v1775_v39, %v1776_v31  ;;  %v1784_v48 = vmax.f32 %v1782_v21, %v1783_v19  ;;  %v1790_v49 = vrot.slane %v1789_v32, 2 }
 0x2b1   : > { %v1797_v50 = vrot.slane %v1796_v13, 2  ;;  %v1803_v23 = vmax.f32 %v1801_v58, %v1802_v33  ;;  %v1811_v51 = vrot.slane %v1810_v60, 2  ;;  %v1817_v54 = vmax.f32 %v1815_v29, %v1816_v35 }
 0x2b2   : > { %v1778_v42 = vrot.slane %v1777_v47, 1  ;;  %v1785_v55 = vrot.slane %v1784_v48, 1  ;;  %v1791_v56 = vmax.f32 %v1789_v32, %v1790_v49  ;;  %v1772_v37 = vmax.f32 %v1770_v30, %v1771_v45 }
 0x2b3   : > { %v1798_v46 = vmax.f32 %v1796_v13, %v1797_v50  ;;  %v1804_v17 = vrot.slane %v1803_v23, 2  ;;  %v1812_v57 = vmax.f32 %v1810_v60, %v1811_v51  ;;  %v1818_v27 = vrot.slane %v1817_v54, 2 }
 0x2b4   : > { %v1779_v52 = vmax.f32 %v1777_v47, %v1778_v42  ;;  %v1786_v43 = vmax.f32 %v1784_v48, %v1785_v55  ;;  %v1792_v61 = vrot.slane %v1791_v56, 1 }
 0x2b5   : > { %v1799_v63 = vrot.slane %v1798_v46, 1  ;;  %v1805_v40 = vmax.f32 %v1803_v23, %v1804_v17  ;;  %v1819_v59 = vmax.f32 %v1817_v54, %v1818_v27  ;;  %v1813_v41 = vrot.slane %v1812_v57, 1 }
 0x2b6   : > { %v1793_v62 = vmax.f32 %v1791_v56, %v1792_v61  ;;  %v1830_v1 = vsel %vm1314_vm7, %v1779_v52, %v1772_v37 }
 0x2b7   : > { %v1806_v44 = vrot.slane %v1805_v40, 1  ;;  %v1820_v2 = vrot.slane %v1819_v59, 1  ;;  %v1800_v4 = vmax.f32 %v1798_v46, %v1799_v63  ;;  %v1831_v5 = vsel %vm1316_vm8, %v1786_v43, %v1830_v1 }
 0x2b8   : > { %v1832_v6 = vsel %vm1318_vm9, %v1793_v62, %v1831_v5  ;;  %v1814_v8 = vmax.f32 %v1812_v57, %v1813_v41 }
 0x2b9   : > { %v1807_v53 = vmax.f32 %v1805_v40, %v1806_v44  ;;  %v1833_v38 = vsel %vm1320_vm10, %v1800_v4, %v1832_v6  ;;  %v1821_v36 = vmax.f32 %v1819_v59, %v1820_v2 }
 0x2bb   : > { %v1834_v9 = vsel %vm1322_vm12, %v1807_v53, %v1833_v38 }
 0x2bc   : > { %v1835_v10 = vsel %vm1324_vm13, %v1814_v8, %v1834_v9 }
 0x2bd   : > { %v1836_v11 = vsel %vm1326_vm2, %v1821_v36, %v1835_v10 }
 0x2be   : > { %1838 = vst [vmem:[%s325_s29] sm:$0xff] %v1836_v11 }
 0x2bf   : > { %2451 = shalt.err (!%p2448_p2)
}
 0x2c0   : > { %s2452_s23 = scalar_lea.hbm %s3091_s9, 128  ;;  %s2456_s12 = scalar_lea.hbm %s3143_s7, 256 }
 0x2c1   : > { %p2453_p13 = scmp.ne.s32.totalorder %s3091_s9, %s2452_s23  ;;  %p2457_p4 = scmp.lt.u32.totalorder %s3091_s9, %s3143_s7 }
 0x2c2   : > { %p2458_p5 = scmp.lt.u32.totalorder %s2456_s12, %s2452_s23  ;;  %p2460_p11 = scmp.lt.u32.totalorder %s2452_s23, %s3091_s9 }
 0x2c3   : > { %p2454_p6 = pnand %p2453_p13, %p3161_p0 }
 0x2c4   : > { %p2459_p8 = por %p2458_p5, %p2457_p4 }
 0x2c5   : > { %p2455_p10 = pneg %p2454_p6 }
 0x2c6   : > { %p2461_p1 = por %p2460_p11, %p2459_p8 }
 0x2c8   : > { %p2462_p3 = pnand %p2461_p1, %p2455_p10 }
 0x2ca   : > { %2465 = shalt.err (!%p2462_p3)
}
 0x2cb   : > { %2223 = dma.vmem_to_hbm [thread:$0]  (%p3161_p0), %s3093_s18, 128, %s3091_s9, %s1840_s28  }
 0x2cc PF: > { %s1865_s21 = sand.u32 1, %s2496_s24   ;;  %p3162_p7 = scmp.ne.s32.totalorder %s3148_s8, 0 }
 0x2cd   : > { %p3163_p9 = scmp.ge.s32.totalorder %s2508_s27, 2  ;;  %s1866_s30 = scalar_lea.sflag [#allocation4], %s1865_s21 }
 0x2cf   : > { %p2237_p12 = pnand %p3163_p9, %p3162_p7 }
 0x2d1   : > { %2491 = dma.done.wait (!%p2237_p12), %s1866_s30, 128  }
 0x2d2   : > { %2493 = vsyncadd (!%p2237_p12), %s1866_s30, 4294967168  ;;  %p21_p2 = scmp.ge.s32.totalorder %s2672_s13, 4   ;;  %s3164_s24 = smov %s2500_s25 }
 0x2d3   : > { %s3165_s25 = smov %s2504_s26  ;;  %s3166_s26 = smov %s2688_s17 }
 0x2d4   : > { %s3167_s27 = smov %s2672_s13  ;;  %23 = sbr.rel (!%p21_p2) target bundleno = 6 (0x6), region = 101 }
 0x2db   :  { %1871 = vsyncpa [#allocation3], 1 }
 0x2dc   :  { %1873 = vsyncpa [#allocation3 + $0x1], 1 }
 0x2dd   :  { %1874 = vsyncpa [#allocation6], 1 }
 0x2de   :  { %1875 = vsyncpa [#allocation4], 1 }
 0x2df   :  { %1877 = vsyncpa [#allocation4 + $0x1], 1 }

</bundles_post_ra>
